<compile_context>
chip_gen: v7x
topology: tpu7x:2x2x1
jax: 0.10.0
libtpu: 0.0.40
codegen_flags: <defaults>
</compile_context>

<pallas_src>
import functools

import jax
import jax.numpy as jnp
from jax.experimental import pallas as pl
from jax.experimental.pallas import tpu as pltpu


# ----------------------------------------------------------------------------
# Pass 1 (only Pallas pass): per-slab conv via a single K=9*C MXU matmul,
# plus per-slab BN partial sums.
# ----------------------------------------------------------------------------
def _conv_stats_kernel(x_ref, w_ref, conv_ref, stats_ref, *, TH, Wo, stride):
    # x_ref:    (1, THp, Wp, C)   bf16 halo'd input slab
    # w_ref:    (9*C, Co)         bf16 weights, (kh, kw, c)-major rows
    # conv_ref: (1, TH*Wo, Co)    bf16 conv output for this slab
    # stats_ref:(1, 2, Co)        f32 [sum; sum-of-squares] over this slab
    x = x_ref[0]                                     # (THp, Wp, C)
    C = x.shape[-1]
    h_span = (TH - 1) * stride + 1
    w_span = (Wo - 1) * stride + 1

    # Build the im2col tile once in VMEM: taps ordered (kh, kw, c) to match
    # the weight reshape done in the wrapper.
    taps = []
    for kh in range(3):                              # fully unrolled, static
        for kw in range(3):
            taps.append(x[kh:kh + h_span:stride, kw:kw + w_span:stride, :])
    im2col = jnp.concatenate(taps, axis=-1)          # (TH, Wo, 9*C) bf16
    im2col = im2col.reshape(TH * Wo, 9 * C)

    # Single accumulated MXU matmul, f32 accumulation.
    acc = jnp.dot(im2col, w_ref[...],
                  preferred_element_type=jnp.float32)  # (TH*Wo, Co) f32

    # bf16 store of the conv intermediate (halves HBM traffic); BN statistics
    # are taken from the f32 accumulator before the cast.
    conv_ref[0] = acc.astype(conv_ref.dtype)
    s = jnp.sum(acc, axis=0, keepdims=True)            # (1, Co)
    ss = jnp.sum(acc * acc, axis=0, keepdims=True)      # (1, Co)
    stats_ref[0] = jnp.concatenate([s, ss], axis=0)     # (2, Co)


# ----------------------------------------------------------------------------
# Wrapper
# ----------------------------------------------------------------------------
def disblock_forward(x_nchw, w_oihw, bias, gamma, beta, *, stride=1,
                     compute_dtype=jnp.bfloat16,
                     conv_store_dtype=jnp.bfloat16,
                     max_tile_rows=512):
    """x_nchw: (N, C, H, W) f32 -> (N, Co, Ho, Wo) f32 (PyTorch DisBlock.forward)."""
    del bias  # conv bias cancels exactly under BatchNorm's mean subtraction.

    N, C, H, W = x_nchw.shape
    Co = w_oihw.shape[0]
    Ho = (H + 2 - 3) // stride + 1
    Wo = (W + 2 - 3) // stride + 1
    Wp = W + 2

    # Output-row tiling: largest divisor TH of Ho with TH*Wo <= max_tile_rows.
    # Keeps every block well under v7x's 64 MiB VMEM and gives N*T grid points.
    TH = 1
    for th in range(1, Ho + 1):
        if Ho % th == 0 and th * Wo <= max_tile_rows:
            TH = th
    T = Ho // TH
    THp = (TH - 1) * stride + 3
    M_tile = TH * Wo

    # Layout plumbing (XLA): NCHW -> NHWC, halo pad, bf16 cast.  Channels are
    # deliberately NOT padded to 128; taps are folded into K inside the kernel.
    x_nhwc = jnp.transpose(x_nchw, (0, 2, 3, 1)).astype(compute_dtype)
    xp = jnp.pad(x_nhwc, ((0, 0), (1, 1), (1, 1), (0, 0)))   # (N, H+2, W+2, C)
    # Overlapping halo'd H-slabs (duplicates 2 rows per slab) so BlockSpecs
    # stay plain Blocked index maps.
    slabs = [xp[:, t * TH * stride: t * TH * stride + THp] for t in range(T)]
    x_tiles = jnp.stack(slabs, axis=1).reshape(N * T, THp, Wp, C)

    # (Co, C, 3, 3) OIHW -> (3, 3, C, Co) -> (9*C, Co), (kh, kw, c)-major rows.
    w = jnp.transpose(w_oihw, (2, 3, 1, 0)).reshape(9 * C, Co)
    w = w.astype(compute_dtype)

    kernel = functools.partial(_conv_stats_kernel, TH=TH, Wo=Wo, stride=stride)

    conv3, stats = pl.pallas_call(
        kernel,
        out_shape=(
            jax.ShapeDtypeStruct((N * T, M_tile, Co), conv_store_dtype),
            jax.ShapeDtypeStruct((N * T, 2, Co), jnp.float32),
        ),
        grid=(N * T,),
        in_specs=[
            pl.BlockSpec((1, THp, Wp, C), lambda i: (i, 0, 0, 0)),
            # Constant index_map: revisit detection fetches the weights once;
            # no per-grid-step re-DMA.
            pl.BlockSpec((9 * C, Co), lambda i: (0, 0)),
        ],
        out_specs=(
            pl.BlockSpec((1, M_tile, Co), lambda i: (i, 0, 0)),
            pl.BlockSpec((1, 2, Co), lambda i: (i, 0, 0)),
        ),
        compiler_params=pltpu.CompilerParams(
            dimension_semantics=("parallel",),   # slabs independent -> megacore
            vmem_limit_bytes=32 * 1024 * 1024,   # safe on v5e/v6e/v7x; tiles are small
        ),
    )(x_tiles, w)

    # ---- Epilogue in plain jnp: XLA fuses scale/shift + LeakyReLU + reshape
    # + NCHW transpose into one read of conv3 and one final write. ----
    count = jnp.float32(N * Ho * Wo)
    s = jnp.sum(stats[:, 0, :], axis=0)
    ss = jnp.sum(stats[:, 1, :], axis=0)
    mean = s / count
    var = ss / count - mean * mean              # biased variance (training-mode BN)
    inv = jax.lax.rsqrt(var + 1e-5)
    scale = gamma.astype(jnp.float32) * inv
    shift = beta.astype(jnp.float32) - mean * scale

    y = conv3.astype(jnp.float32) * scale + shift
    y = jnp.where(y > 0, y, 0.2 * y)
    y = y.reshape(N, Ho, Wo, Co)
    return jnp.transpose(y, (0, 3, 1, 2))        # back to NCHW


# ----------------------------------------------------------------------------
# Pure-JAX reference matching PyTorch DisBlock.forward (training-mode BN)
# ----------------------------------------------------------------------------
def reference_forward(x, w, b, gamma, beta, *, stride=1):
    conv = jax.lax.conv_general_dilated(
        x, w, window_strides=(stride, stride), padding=((1, 1), (1, 1)),
        dimension_numbers=("NCHW", "OIHW", "NCHW"),
        preferred_element_type=jnp.float32)
    conv = conv + b[None, :, None, None]
    mean = conv.mean(axis=(0, 2, 3), keepdims=True)
    var = ((conv - mean) ** 2).mean(axis=(0, 2, 3), keepdims=True)
    y = (conv - mean) / jnp.sqrt(var + 1e-5)
    y = y * gamma[None, :, None, None] + beta[None, :, None, None]
    return jnp.where(y > 0, y, 0.2 * y)


if __name__ == "__main__":
    # DisBlock(channel=4, scale=1, stride=1)
    channel, scale_mult, stride = 4, 1, 1
    c_out = channel * scale_mult
    N, H, W = 2, 16, 16

    key = jax.random.PRNGKey(0)
    kx, kw, kb, kg, kbe = jax.random.split(key, 5)

    x = jax.random.normal(kx, (N, channel, H, W), jnp.float32)
    conv_w = 0.1 * jax.random.normal(kw, (c_out, channel, 3, 3), jnp.float32)
    conv_b = 0.1 * jax.random.normal(kb, (c_out,), jnp.float32)
    bn_gamma = 1.0 + 0.1 * jax.random.normal(kg, (c_out,), jnp.float32)
    bn_beta = 0.1 * jax.random.normal(kbe, (c_out,), jnp.float32)

    fwd = jax.jit(functools.partial(disblock_forward, stride=stride))
    out = jax.block_until_ready(fwd(x, conv_w, conv_b, bn_gamma, bn_beta))

    # Reference uses the SAME bf16-quantized conv operands the kernel uses.
    xq = x.astype(jnp.bfloat16).astype(jnp.float32)
    wq = conv_w.astype(jnp.bfloat16).astype(jnp.float32)
    ref = jax.block_until_ready(
        reference_forward(xq, wq, conv_b, bn_gamma, bn_beta, stride=stride))

    assert out.shape == (N, c_out, H, W), out.shape
    max_err = float(jnp.max(jnp.abs(out - ref)))
    # bf16 MXU operands + bf16 conv intermediate are deliberate perf choices
    # (review item); after BN the rounding floor is ~bf16_eps * |conv|/std *
    # gamma ≈ 2e-2 worst case, so tolerance is set accordingly.
    assert max_err < 3e-2, max_err

    print("KERNEL_OK")
</pallas_src>

<mosaic_0001>
module attributes {stable_mosaic.version = 11 : i64} {
  func.func @_conv_stats_kernel(%arg0: i32, %arg1: memref<1x18x18x4xbf16, #tpu.memory_space<vmem>>, %arg2: memref<36x4xbf16, #tpu.memory_space<vmem>>, %arg3: memref<1x256x4xbf16, #tpu.memory_space<vmem>>, %arg4: memref<1x2x4xf32, #tpu.memory_space<vmem>>) attributes {dimension_semantics = [#tpu.dimension_semantics<parallel>], iteration_bounds = array<i64: 2>, scalar_prefetch = 0 : i64, scratch_operands = 0 : i64, tpu.core_type = #tpu.core_type<tc>, window_params = [{transform_indices = @transform_0, window_bounds = array<i64: 1, 18, 18, 4>}, {pipeline_mode = #tpu.pipeline_mode<synchronous>, transform_indices = @transform_1, window_bounds = array<i64: 36, 4>}, {transform_indices = @transform_2, window_bounds = array<i64: 1, 256, 4>}, {transform_indices = @transform_3, window_bounds = array<i64: 1, 2, 4>}]} {
    %c0 = arith.constant 0 : index
    %c0_0 = arith.constant 0 : index
    %c0_1 = arith.constant 0 : index
    %c0_2 = arith.constant 0 : index
    %0 = vector.load %arg1[%c0, %c0_0, %c0_1, %c0_2] : memref<1x18x18x4xbf16, #tpu.memory_space<vmem>>, vector<1x18x18x4xbf16>
    %1 = vector.shape_cast %0 : vector<1x18x18x4xbf16> to vector<18x18x4xbf16>
    %2 = vector.extract_strided_slice %1 {offsets = [0, 0, 0], sizes = [16, 16, 4], strides = [1, 1, 1]} : vector<18x18x4xbf16> to vector<16x16x4xbf16>
    %3 = vector.extract_strided_slice %1 {offsets = [0, 1, 0], sizes = [16, 16, 4], strides = [1, 1, 1]} : vector<18x18x4xbf16> to vector<16x16x4xbf16>
    %4 = vector.extract_strided_slice %1 {offsets = [0, 2, 0], sizes = [16, 16, 4], strides = [1, 1, 1]} : vector<18x18x4xbf16> to vector<16x16x4xbf16>
    %5 = vector.extract_strided_slice %1 {offsets = [1, 0, 0], sizes = [16, 16, 4], strides = [1, 1, 1]} : vector<18x18x4xbf16> to vector<16x16x4xbf16>
    %6 = vector.extract_strided_slice %1 {offsets = [1, 1, 0], sizes = [16, 16, 4], strides = [1, 1, 1]} : vector<18x18x4xbf16> to vector<16x16x4xbf16>
    %7 = vector.extract_strided_slice %1 {offsets = [1, 2, 0], sizes = [16, 16, 4], strides = [1, 1, 1]} : vector<18x18x4xbf16> to vector<16x16x4xbf16>
    %8 = vector.extract_strided_slice %1 {offsets = [2, 0, 0], sizes = [16, 16, 4], strides = [1, 1, 1]} : vector<18x18x4xbf16> to vector<16x16x4xbf16>
    %9 = vector.extract_strided_slice %1 {offsets = [2, 1, 0], sizes = [16, 16, 4], strides = [1, 1, 1]} : vector<18x18x4xbf16> to vector<16x16x4xbf16>
    %10 = vector.extract_strided_slice %1 {offsets = [2, 2, 0], sizes = [16, 16, 4], strides = [1, 1, 1]} : vector<18x18x4xbf16> to vector<16x16x4xbf16>
    %11 = tpu.concatenate %2, %3, %4, %5, %6, %7, %8, %9, %10 in 2 : vector<16x16x4xbf16>, vector<16x16x4xbf16>, vector<16x16x4xbf16>, vector<16x16x4xbf16>, vector<16x16x4xbf16>, vector<16x16x4xbf16>, vector<16x16x4xbf16>, vector<16x16x4xbf16>, vector<16x16x4xbf16> -> vector<16x16x36xbf16>
    %12 = vector.shape_cast %11 : vector<16x16x36xbf16> to vector<256x36xbf16>
    %c0_3 = arith.constant 0 : index
    %c0_4 = arith.constant 0 : index
    %13 = vector.load %arg2[%c0_3, %c0_4] : memref<36x4xbf16, #tpu.memory_space<vmem>>, vector<36x4xbf16>
    %cst = arith.constant dense<0.000000e+00> : vector<256x4xf32>
    %14 = tpu.matmul %12, %13, %cst {dimension_numbers = #tpu.dot_dimension_numbers<[1], [0], [0], [1], [0, 0, 1, 1], [], []>} : vector<256x36xbf16>, vector<36x4xbf16>, vector<256x4xf32> -> vector<256x4xf32>
    %15 = arith.truncf %14 : vector<256x4xf32> to vector<256x4xbf16>
    %c0_5 = arith.constant 0 : index
    %c0_6 = arith.constant 0 : index
    %c0_7 = arith.constant 0 : index
    %16 = vector.load %arg3[%c0_5, %c0_6, %c0_7] : memref<1x256x4xbf16, #tpu.memory_space<vmem>>, vector<1x256x4xbf16>
    %17 = vector.shape_cast %16 : vector<1x256x4xbf16> to vector<256x4xbf16>
    %18 = vector.shape_cast %15 : vector<256x4xbf16> to vector<1x256x4xbf16>
    tpu.vector_store %arg3[%c0_5, %c0_6, %c0_7], %18 {strides = array<i32>} : memref<1x256x4xbf16, #tpu.memory_space<vmem>>, vector<1x256x4xbf16>,
    %cst_8 = arith.constant dense<0.000000e+00> : vector<4xf32>
    %19 = vector.multi_reduction <add>, %14, %cst_8 [0] : vector<256x4xf32> to vector<4xf32>
    %20 = vector.shape_cast %19 : vector<4xf32> to vector<1x4xf32>
    %21 = arith.mulf %14, %14 : vector<256x4xf32>
    %cst_9 = arith.constant dense<0.000000e+00> : vector<4xf32>
    %22 = vector.multi_reduction <add>, %21, %cst_9 [0] : vector<256x4xf32> to vector<4xf32>
    %23 = vector.shape_cast %22 : vector<4xf32> to vector<1x4xf32>
    %24 = tpu.concatenate %20, %23 in 0 : vector<1x4xf32>, vector<1x4xf32> -> vector<2x4xf32>
    %c0_10 = arith.constant 0 : index
    %c0_11 = arith.constant 0 : index
    %c0_12 = arith.constant 0 : index
    %25 = vector.load %arg4[%c0_10, %c0_11, %c0_12] : memref<1x2x4xf32, #tpu.memory_space<vmem>>, vector<1x2x4xf32>
    %26 = vector.shape_cast %25 : vector<1x2x4xf32> to vector<2x4xf32>
    %27 = vector.shape_cast %24 : vector<2x4xf32> to vector<1x2x4xf32>
    tpu.vector_store %arg4[%c0_10, %c0_11, %c0_12], %27 {strides = array<i32>} : memref<1x2x4xf32, #tpu.memory_space<vmem>>, vector<1x2x4xf32>,
    return
  }
  func.func @transform_0(%arg0: i32) -> (i32, i32, i32, i32) {
    %c0_i32 = arith.constant 0 : i32
    %c0_i32_0 = arith.constant 0 : i32
    %c0_i32_1 = arith.constant 0 : i32
    %c0_i32_2 = arith.constant 0 : i32
    return %arg0, %c0_i32, %c0_i32_0, %c0_i32_1 : i32, i32, i32, i32
  }
  func.func @transform_1(%arg0: i32) -> (i32, i32) {
    %c0_i32 = arith.constant 0 : i32
    %c0_i32_0 = arith.constant 0 : i32
    %c0_i32_1 = arith.constant 0 : i32
    return %c0_i32, %c0_i32_0 : i32, i32
  }
  func.func @transform_2(%arg0: i32) -> (i32, i32, i32) {
    %c0_i32 = arith.constant 0 : i32
    %c0_i32_0 = arith.constant 0 : i32
    %c0_i32_1 = arith.constant 0 : i32
    return %arg0, %c0_i32, %c0_i32_0 : i32, i32, i32
  }
  func.func @transform_3(%arg0: i32) -> (i32, i32, i32) {
    %c0_i32 = arith.constant 0 : i32
    %c0_i32_0 = arith.constant 0 : i32
    %c0_i32_1 = arith.constant 0 : i32
    return %arg0, %c0_i32, %c0_i32_0 : i32, i32, i32
  }
}

</mosaic_0001>

<bundles_post_ra>
// kernel: disblock_forward.1
= control target key start
LH: loop header
LB: loop body
LE: loop exit
PB: predicated region body
PF: predicated region fallthrough
CT: control target
= control target key end

     0   :  { %s2100_s12 = smov 0   ;;  %s2742_s0 = inlined_call_operand.vmem [shape: bf16[2,18,18,4], index: 0, kind: input, shape index: {}]   ;;  %s2743_s1 = inlined_call_operand.vmem [shape: bf16[36,4], index: 1, kind: input, shape index: {}]   ;;  %s2744_s2 = inlined_call_operand.vmem [shape: bf16[2,256,4], index: 2, kind: output, shape index: {0}]   ;;  %s2745_s3 = inlined_call_operand.vmem [shape: f32[2,2,4], index: 3, kind: output, shape index: {1}]  }
   0x1 LB: > { %s1812_s13 = sadd.s32 4294967295, %s2070_s12   ;;  %p1816_p0 = scmp.ge.s32.totalorder %s2070_s12, 1  ;;  %s2070_s12 = sphi %s2100_s12, %s14_s12  }
   0x2   : > { %p140_p1 = scmp.lt.s32.totalorder %s2070_s12, 3 }
   0x4   : > { %p141_p2 = pnand %p1816_p0, %p140_p1 }
   0x5   : > { %p168_p3 = scmp.lt.s32.totalorder (!%p141_p2), %s1812_s13, 1  ;;  %vm590_vm0 = vcmask (!%p141_p2), 1046528   ;;  %s2072_s18 = smov (!%p141_p2), 12   ;;  %vm365_vm1 = vsmask.f32 (!%p141_p2), 7424  ;;  %v2045_v44 = vld [vmem:[%s2743_s1] sm:$0xff] (!%p141_p2)  }
   0x6   : > { %144 = sbr.rel (%p141_p2) target bundleno = 625 (0x271), region = 28  ;;  %s2073_s19 = smov (!%p141_p2), 20   ;;  %1962 = vmatprep.subr.bf16.mxu0 (!%p141_p2), %v2045_v44  ;;  %v2047_v46 = vld [vmem:[%s2743_s1 + $0x8] sm:$0xff] (!%p141_p2)   ;;  %2000 = vmatprep.subr.bf16.mxu1 (!%p141_p2), %v2045_v44  ;;  %v2049_v50 = vld [vmem:[%s2743_s1 + $0x10] ss:$0 sps:$4 sm:$0x33] (!%p141_p2)  }
   0x7   : > { %s2074_s20 = smov (!%p141_p2), 8   ;;  %s2075_s21 = smov (!%p141_p2), 4   ;;  %1963 = vmatpush3.bf16.msra.mxu0 (!%p141_p2), %v2045_v44  ;;  %2003 = vmatpush3.bf16.msra.mxu1 (!%p141_p2), %v2045_v44  ;;  %vm1226_vm2 = vcmask (!%p141_p2), 1041408   ;;  %vm909_vm3 = vcmask (!%p141_p2), 31744   ;;  %vm942_vm4 = vcmask (!%p141_p2), 64512   ;;  %vm975_vm5 = vcmask (!%p141_p2), 97280  }
   0x8   : > { %s2076_s22 = smov (!%p141_p2), 16   ;;  %s2077_s25 = smov (!%p141_p2), 24   ;;  %1964 = vmatprep.subr.bf16.mxu0 (!%p141_p2), %v2047_v46  ;;  %2001 = vmatprep.subr.bf16.mxu1 (!%p141_p2), %v2047_v46  ;;  %v1228_v54 = vsel (!%p141_p2), %vm1226_vm2, %v2049_v50, 0  ;;  %vm1008_vm6 = vcmask (!%p141_p2), 130048   ;;  %vm1041_vm7 = vcmask (!%p141_p2), 162816   ;;  %vm1074_vm8 = vcmask (!%p141_p2), 195584  }
   0x9   : > { %s2078_s28 = smov (!%p141_p2), 28   ;;  %s2079_s4 = smov (!%p141_p2), 32   ;;  %vm1107_vm9 = vcmask (!%p141_p2), 228352   ;;  %vm1140_vm10 = vcmask (!%p141_p2), 261120   ;;  %vm1193_vm11 = vcmask (!%p141_p2), 293888   ;;  %vm1519_vm12 = vcmask (!%p141_p2), 27648  }
   0xa   : > { %vm1722_vm13 = vcmask (!%p141_p2), 1040384   ;;  %vm1724_vm14 = vcmask (!%p141_p2), 25600  }
   0xb   : > { %1965 = vmatpush3.bf16.msra.mxu0 (!%p141_p2), %v2047_v46  ;;  %2004 = vmatpush3.bf16.msra.mxu1 (!%p141_p2), %v2047_v46 }
   0xc   : > { %2006 = vmatprep.subr.msk.bf16.mxu0 (!%p141_p2), %vm1226_vm2, %v2049_v50  ;;  %2007 = vmatprep.subr.msk.bf16.mxu1 (!%p141_p2), %vm1226_vm2, %v2049_v50 }
   0xd   : > { %s2747_s13 = smov (!%p168_p3, %s1812_s13), 1 }
   0xe   : > { %s2008_s14 = smul.u32 216, %s2747_s13  ;;  %s1910_s5 = sshll.u32 %s2747_s13, 7 }
   0xf   : > { %1967 = vmatpush3.bf16.msra.mxu0 %v1228_v54  ;;  %2005 = vmatpush3.bf16.msra.mxu1 %v1228_v54  ;;  %s2590_s8 = scalar_lea.vmem %s2744_s2, %s1910_s5  ;;  %s1820_s9 = sshll.u32 %s2747_s13, 1 }
  0x10   : > { %s2114_s17 = scalar_lea.vmem %s2742_s0, %s2008_s14  ;;  %s181_s14 = scalar_lea.vmem %s2745_s3, %s1820_s9 }
  0x11   : > { %v2117_v0 = vld [vmem:[%s2114_s17 + $0x18] sm:$0xff]   ;;  %v2120_v1 = vld [vmem:[%s2114_s17 + $0xc] sm:$0xff]   ;;  %v2027_v2 = vld [vmem:[%s2114_s17 + $0x14] ss:$0 sps:$4 sm:$0x11]  }
  0x12   : > { %678 = vrot.lane.b32.xlu1 %v2117_v0, %s2072_s18  ;;  %v2126_v3 = vld [vmem:[%s2114_s17] sm:$0xff]   ;;  %676 = vrot.lane.b32.xlu0 %v2120_v1, %s2072_s18  ;;  %v594_v4 = vrot.slane %v2120_v1, 1  ;;  %v595_v5 = vrot.slane %v2027_v2, 1  ;;  %v2029_v6 = vld [vmem:[%s2114_s17 + $0x8] ss:$0 sps:$4 sm:$0x11]  }
  0x13   : > { %v591_v7 = vrot.slane %v2126_v3, 1  ;;  %v367_v8 = vshrl.u32 %v2126_v3, 16  ;;  %v369_v9 = vshll.u32 %v2126_v3, 16  ;;  %v379_v10 = vshrl.u32 %v2120_v1, 16  ;;  %v2146_v30 = vld [vmem:[%s2114_s17 + $0x24] sm:$0xff]   ;;  %v2176_v49 = vld [vmem:[%s2114_s17 + $0x30] sm:$0xff]  }
  0x14   : > { %v596_v11 = vsel %vm590_vm0, %v594_v4, %v595_v5  ;;  %v592_v12 = vrot.slane %v2029_v6, 1  ;;  %v374_v13 = vshll.u32 %v2029_v6, 16  ;;  %v2030_v14 = vld [vmem:[%s2114_s17 + $0x20] ss:$0 sps:$4 sm:$0x11]   ;;  %v381_v15 = vshll.u32 %v2120_v1, 16 }
  0x15   : > { %v371_v16 = vrot.slane %v369_v9, 1  ;;  %v386_v17 = vshll.u32 %v2027_v2, 16  ;;  %v393_v18 = vshll.u32 %v2117_v0, 16  ;;  %v597_v23 = vrot.slane %v2117_v0, 1  ;;  %v2192_v60 = vld [vmem:[%s2114_s17 + $0x3c] sm:$0xff]  }
  0x16   : > { %758 = vrot.lane.b32.xlu0 %v596_v11, %s2073_s19  ;;  %v593_v19 = vsel %vm590_vm0, %v591_v7, %v592_v12  ;;  %v376_v20 = vrot.slane %v374_v13, 1  ;;  %v383_v21 = vrot.slane %v381_v15, 1  ;;  %v391_v25 = vshrl.u32 %v2117_v0, 16  ;;  %v2032_v33 = vld [vmem:[%s2114_s17 + $0x2c] ss:$0 sps:$4 sm:$0x11]  }
  0x17   : > { %639 = vrot.lane.b32.xlu1 %v593_v19, %s2074_s20  ;;  %v372_v22 = vor.u32 %v371_v16, %v367_v8  ;;  %v388_v24 = vrot.slane %v386_v17, 1  ;;  %v598_v26 = vrot.slane %v2030_v14, 1  ;;  %v395_v28 = vrot.slane %v393_v18, 1  ;;  %v2034_v51 = vld [vmem:[%s2114_s17 + $0x38] ss:$0 sps:$4 sm:$0x11]  }
  0x18   : > { %v384_v27 = vor.u32 %v383_v21, %v379_v10  ;;  %v398_v29 = vshll.u32 %v2030_v14, 16  ;;  %v405_v37 = vshll.u32 %v2146_v30, 16  ;;  %v403_v39 = vshrl.u32 %v2146_v30, 16  ;;  %v2036_v2 = vld [vmem:[%s2114_s17 + $0x44] ss:$0 sps:$4 sm:$0x11]  }
  0x19   : > { %v377_v31 = vsel %vm365_vm1, %v372_v22, %v376_v20  ;;  %v599_v34 = vsel %vm590_vm0, %v597_v23, %v598_v26  ;;  %v396_v35 = vor.u32 %v395_v28, %v391_v25  ;;  %v410_v41 = vshll.u32 %v2032_v33, 16  ;;  %v2217_v14 = vld [vmem:[%s2114_s17 + $0x48] sm:$0xff]   ;;  %v2038_v16 = vld [vmem:[%s2114_s17 + $0x50] ss:$0 sps:$4 sm:$0x11]   ;;  %v2230_v23 = vld [vmem:[%s2114_s17 + $0x54] sm:$0xff]  }
  0x1a   : > { %558 = vrot.lane.b32.xlu0 %v377_v31, %s2075_s21  ;;  %v389_v32 = vsel %vm365_vm1, %v384_v27, %v388_v24  ;;  %v400_v36 = vrot.slane %v398_v29, 1  ;;  %v407_v40 = vrot.slane %v405_v37, 1  ;;  %v600_v47 = vrot.slane %v2146_v30, 1  ;;  %v2040_v27 = vld [vmem:[%s2114_s17 + $0x5c] ss:$0 sps:$4 sm:$0x11]  }
  0x1b   : > { %641 = vrot.lane.b32.xlu1 %v596_v11, %s2074_s20  ;;  %v412_v43 = vrot.slane %v410_v41, 1  ;;  %v601_v48 = vrot.slane %v2032_v33, 1  ;;  %v417_v53 = vshll.u32 %v2176_v49, 16  ;;  %v415_v55 = vshrl.u32 %v2176_v49, 16 }
  0x1c   : > { %v401_v38 = vsel %vm365_vm1, %v396_v35, %v400_v36  ;;  %v408_v42 = vor.u32 %v407_v40, %v403_v39  ;;  %v422_v57 = vshll.u32 %v2034_v51, 16  ;;  %v603_v62 = vrot.slane %v2176_v49, 1  ;;  %v2255_v39 = vld [vmem:[%s2114_s17 + $0x60] sm:$0xff]   ;;  %v2042_v41 = vld [vmem:[%s2114_s17 + $0x68] ss:$0 sps:$4 sm:$0x11]  }
  0x1d   : > { %v602_v52 = vsel %vm590_vm0, %v600_v47, %v601_v48  ;;  %v419_v56 = vrot.slane %v417_v53, 1  ;;  %v604_v63 = vrot.slane %v2034_v51, 1  ;;  %v429_v4 = vshll.u32 %v2192_v60, 16  ;;  %v2268_v48 = vld [vmem:[%s2114_s17 + $0x6c] sm:$0xff]  }
  0x1e   : > { %560 = vrot.lane.b32.xlu0 %v389_v32, %s2075_s21  ;;  %v413_v45 = vsel %vm365_vm1, %v408_v42, %v412_v43  ;;  %v424_v59 = vrot.slane %v422_v57, 1  ;;  %v427_v6 = vshrl.u32 %v2192_v60, 16  ;;  %v434_v8 = vshll.u32 %v2036_v2, 16  ;;  %v2044_v53 = vld [vmem:[%s2114_s17 + $0x74] ss:$0 sps:$4 sm:$0x11]  }
  0x1f   : > { %760 = vrot.lane.b32.xlu1 %v599_v34, %s2073_s19  ;;  %v420_v58 = vor.u32 %v419_v56, %v415_v55  ;;  %v605_v5 = vsel %vm590_vm0, %v603_v62, %v604_v63  ;;  %v431_v7 = vrot.slane %v429_v4, 1  ;;  %v606_v12 = vrot.slane %v2192_v60, 1 }
  0x20   : > { %v436_v10 = vrot.slane %v434_v8, 1  ;;  %v607_v13 = vrot.slane %v2036_v2, 1  ;;  %v441_v17 = vshll.u32 %v2217_v14, 16  ;;  %v439_v18 = vshrl.u32 %v2217_v14, 16 }
  0x21   : > { %v425_v61 = vsel %vm365_vm1, %v420_v58, %v424_v59  ;;  %v432_v9 = vor.u32 %v431_v7, %v427_v6  ;;  %v446_v20 = vshll.u32 %v2038_v16, 16  ;;  %v609_v25 = vrot.slane %v2217_v14, 1 }
  0x22   : > { %723 = vrot.lane.b32.xlu0 %v389_v32, %s2076_s22  ;;  %v608_v15 = vsel %vm590_vm0, %v606_v12, %v607_v13  ;;  %v443_v19 = vrot.slane %v441_v17, 1  ;;  %v610_v26 = vrot.slane %v2038_v16, 1  ;;  %v453_v28 = vshll.u32 %v2230_v23, 16  ;;  %v2048_v13 = vld [vmem:[%s2114_s17 + $0x80] ss:$0 sps:$4 sm:$0x11]  }
  0x23   : > { %725 = vrot.lane.b32.xlu1 %v401_v38, %s2076_s22  ;;  %v437_v11 = vsel %vm365_vm1, %v432_v9, %v436_v10  ;;  %v448_v22 = vrot.slane %v446_v20, 1  ;;  %v451_v31 = vshrl.u32 %v2230_v23, 16  ;;  %v458_v33 = vshll.u32 %v2040_v27, 16  ;;  %v2293_v9 = vld [vmem:[%s2114_s17 + $0x78] sm:$0xff]  }
  0x24   : > { %v444_v21 = vor.u32 %v443_v19, %v439_v18  ;;  %v611_v29 = vsel %vm590_vm0, %v609_v25, %v610_v26  ;;  %v455_v32 = vrot.slane %v453_v28, 1  ;;  %v612_v37 = vrot.slane %v2230_v23, 1  ;;  %v2311_v28 = vld [vmem:[%s2114_s17 + $0x84] sm:$0xff]  }
  0x25   : > { %v460_v35 = vrot.slane %v458_v33, 1  ;;  %v465_v42 = vshll.u32 %v2255_v39, 16  ;;  %v463_v43 = vshrl.u32 %v2255_v39, 16  ;;  %v615_v51 = vrot.slane %v2255_v39, 1 }
  0x26   : > { %795 = vrot.lane.b32.xlu0 %v2117_v0, %s2077_s25  ;;  %v449_v24 = vsel %vm365_vm1, %v444_v21, %v448_v22  ;;  %v477_v54 = vshll.u32 %v2268_v48, 16  ;;  %v475_v56 = vshrl.u32 %v2268_v48, 16  ;;  %v482_v58 = vshll.u32 %v2044_v53, 16 }
  0x27   : > { %797 = vrot.lane.b32.xlu1 %v2146_v30, %s2077_s25  ;;  %v467_v44 = vrot.slane %v465_v42, 1  ;;  %v618_v6 = vrot.slane %v2268_v48, 1  ;;  %v619_v7 = vrot.slane %v2044_v53, 1  ;;  %v487_v19 = vshrl.u32 %v2293_v9, 16 }
  0x28   : > { %v479_v57 = vrot.slane %v477_v54, 1  ;;  %v484_v63 = vrot.slane %v482_v58, 1  ;;  %v494_v21 = vshll.u32 %v2048_v13, 16  ;;  %v621_v33 = vrot.slane %v2293_v9, 1 }
  0x29   : > { %v468_v46 = vor.u32 %v467_v44, %v463_v43 }
  0x2a   : > { %842 = vrot.lane.b32.xlu0 %v401_v38, %s2078_s28  ;;  %v480_v62 = vor.u32 %v479_v57, %v475_v56 }
  0x2b   : > { %844 = vrot.lane.b32.xlu1 %v413_v45, %s2078_s28 }
  0x2c   : > { %v485_v4 = vsel %vm365_vm1, %v480_v62, %v484_v63 }
  0x2e   : > { %877 = vrot.lane.b32.xlu0 %v599_v34, %s2079_s4 }
  0x2f   : > { %562 = vrot.lane.b32.xlu1 %v401_v38, %s2075_s21  ;;  %v613_v38 = vrot.slane %v2040_v27, 1 }
  0x31   : > { %v614_v40 = vsel %vm590_vm0, %v612_v37, %v613_v38  ;;  %v2051_v38 = vld [vmem:[%s2114_s17 + $0x8c] ss:$0 sps:$4 sm:$0x11]  }
  0x32   : > { %879 = vrot.lane.b32.xlu0 %v602_v52, %s2079_s4 }
  0x33   : > { %564 = vrot.lane.b32.xlu1 %v413_v45, %s2075_s21 }
  0x36   : > { %643 = vrot.lane.b32.xlu0 %v599_v34, %s2074_s20  ;;  %v456_v34 = vor.u32 %v455_v32, %v451_v31 }
  0x37   : > { %645 = vrot.lane.b32.xlu1 %v602_v52, %s2074_s20 }
  0x38   : > { %v461_v36 = vsel %vm365_vm1, %v456_v34, %v460_v35  ;;  %v622_v34 = vrot.slane %v2048_v13, 1 }
  0x3a   : > { %680 = vrot.lane.b32.xlu0 %v2146_v30, %s2072_s18 }
  0x3b   : > { %682 = vrot.lane.b32.xlu1 %v2176_v49, %s2072_s18 }
  0x3e   : > { %727 = vrot.lane.b32.xlu0 %v413_v45, %s2076_s22  ;;  %v470_v45 = vshll.u32 %v2042_v41, 16 }
  0x3f   : > { %729 = vrot.lane.b32.xlu1 %v425_v61, %s2076_s22 }
  0x40   : > { %v472_v47 = vrot.slane %v470_v45, 1  ;;  %v623_v45 = vsel %vm590_vm0, %v621_v33, %v622_v34 }
  0x42   : > { %762 = vrot.lane.b32.xlu0 %v602_v52, %s2073_s19  ;;  %v473_v50 = vsel %vm365_vm1, %v468_v46, %v472_v47  ;;  %v616_v52 = vrot.slane %v2042_v41, 1 }
  0x43   : > { %764 = vrot.lane.b32.xlu1 %v605_v5, %s2073_s19 }
  0x44   : > { %v617_v55 = vsel %vm590_vm0, %v615_v51, %v616_v52  ;;  %v506_v52 = vshll.u32 %v2051_v38, 16 }
  0x46   : > { %799 = vrot.lane.b32.xlu0 %v2176_v49, %s2077_s25 }
  0x47   : > { %801 = vrot.lane.b32.xlu1 %v2192_v60, %s2077_s25 }
  0x4a   : > { %846 = vrot.lane.b32.xlu0 %v425_v61, %s2078_s28 }
  0x4b   : > { %848 = vrot.lane.b32.xlu1 %v437_v11, %s2078_s28 }
  0x4e   : > { %881 = vrot.lane.b32.xlu0 %v605_v5, %s2079_s4 }
  0x4f   : > { %566 = vrot.lane.b32.xlu1 %v425_v61, %s2075_s21 }
  0x52   : > { %883 = vrot.lane.b32.xlu0 %v608_v15, %s2079_s4 }
  0x53   : > { %568 = vrot.lane.b32.xlu1 %v437_v11, %s2075_s21 }
  0x56   : > { %647 = vrot.lane.b32.xlu0 %v605_v5, %s2074_s20 }
  0x57   : > { %649 = vrot.lane.b32.xlu1 %v608_v15, %s2074_s20 }
  0x5a   : > { %684 = vrot.lane.b32.xlu0 %v2192_v60, %s2072_s18 }
  0x5b   : > { %686 = vrot.lane.b32.xlu1 %v2217_v14, %s2072_s18 }
  0x5e   : > { %731 = vrot.lane.b32.xlu0 %v437_v11, %s2076_s22  ;;  %v620_v11 = vsel %vm590_vm0, %v618_v6, %v619_v7  ;;  %v624_v6 = vrot.slane %v2311_v28, 1  ;;  %v625_v7 = vrot.slane %v2051_v38, 1 }
  0x5f   : > { %733 = vrot.lane.b32.xlu1 %v449_v24, %s2076_s22 }
  0x62   : > { %766 = vrot.lane.b32.xlu0 %v608_v15, %s2073_s19  ;;  %v489_v15 = vshll.u32 %v2293_v9, 16 }
  0x63   : > { %768 = vrot.lane.b32.xlu1 %v611_v29, %s2073_s19 }
  0x64   : > { %v491_v20 = vrot.slane %v489_v15, 1  ;;  %v2053_v15 = vld [vmem:[%s2114_s17 + $0x98] ss:$0 sps:$4 sm:$0x11]  }
  0x66   : > { %803 = vrot.lane.b32.xlu0 %v2217_v14, %s2077_s25  ;;  %v492_v27 = vor.u32 %v491_v20, %v487_v19 }
  0x67   : > { %805 = vrot.lane.b32.xlu1 %v2230_v23, %s2077_s25 }
  0x6a   : > { %850 = vrot.lane.b32.xlu0 %v449_v24, %s2078_s28 }
  0x6b   : > { %852 = vrot.lane.b32.xlu1 %v461_v36, %s2078_s28 }
  0x6e   : > { %885 = vrot.lane.b32.xlu0 %v611_v29, %s2079_s4 }
  0x6f   : > { %570 = vrot.lane.b32.xlu1 %v449_v24, %s2075_s21 }
  0x72   : > { %887 = vrot.lane.b32.xlu0 %v614_v40, %s2079_s4 }
  0x73   : > { %572 = vrot.lane.b32.xlu1 %v461_v36, %s2075_s21 }
  0x76   : > { %651 = vrot.lane.b32.xlu0 %v611_v29, %s2074_s20 }
  0x77   : > { %653 = vrot.lane.b32.xlu1 %v614_v40, %s2074_s20 }
  0x7a   : > { %688 = vrot.lane.b32.xlu0 %v2230_v23, %s2072_s18 }
  0x7b   : > { %690 = vrot.lane.b32.xlu1 %v2255_v39, %s2072_s18 }
  0x7e   : > { %735 = vrot.lane.b32.xlu0 %v461_v36, %s2076_s22 }
  0x7f   : > { %737 = vrot.lane.b32.xlu1 %v473_v50, %s2076_s22 }
  0x82   : > { %770 = vrot.lane.b32.xlu0 %v614_v40, %s2073_s19  ;;  %v501_v40 = vshll.u32 %v2311_v28, 16 }
  0x83   : > { %772 = vrot.lane.b32.xlu1 %v617_v55, %s2073_s19 }
  0x84   : > { %v679_v59 = vpop.permute.xlu1 %678  ;;  %v677_v61 = vpop.permute.xlu0 %676  ;;  %v503_v51 = vrot.slane %v501_v40, 1 }
  0x86   : > { %807 = vrot.lane.b32.xlu0 %v2255_v39, %s2077_s25 }
  0x87   : > { %809 = vrot.lane.b32.xlu1 %v2268_v48, %s2077_s25 }
  0x88   : > { %v759_v2 = vpop.permute.xlu0 %758 }
  0x89   : > { %v640_v5 = vpop.permute.xlu1 %639 }
  0x8a   : > { %854 = vrot.lane.b32.xlu0 %v473_v50, %s2078_s28 }
  0x8b   : > { %856 = vrot.lane.b32.xlu1 %v485_v4, %s2078_s28 }
  0x8c   : > { %v559_v8 = vpop.permute.xlu0 %558 }
  0x8d   : > { %v642_v10 = vpop.permute.xlu1 %641  ;;  %v911_v17 = vsel %vm909_vm3, %v2126_v3, %v559_v8  ;;  %v496_v3 = vrot.slane %v494_v21, 1  ;;  %v518_v21 = vshll.u32 %v2053_v15, 16 }
  0x8e   : > { %889 = vrot.lane.b32.xlu0 %v617_v55, %s2079_s4  ;;  %v944_v25 = vsel %vm942_vm4, %v911_v17, %v640_v5 }
  0x8f   : > { %574 = vrot.lane.b32.xlu1 %v473_v50, %s2075_s21  ;;  %v977_v32 = vsel %vm975_vm5, %v944_v25, %v677_v61  ;;  %v497_v37 = vsel %vm365_vm1, %v492_v27, %v496_v3  ;;  %v499_v50 = vshrl.u32 %v2311_v28, 16  ;;  %v508_v61 = vrot.slane %v506_v52, 1  ;;  %v2364_v27 = vld [vmem:[%s2114_s17 + $0x9c] sm:$0xff]  }
  0x90   : > { %v561_v12 = vpop.permute.xlu0 %560 }
  0x91   : > { %v761_v16 = vpop.permute.xlu1 %760  ;;  %v913_v24 = vsel %vm909_vm3, %v2120_v1, %v561_v12  ;;  %v626_v12 = vsel %vm590_vm0, %v624_v6, %v625_v7  ;;  %v630_v6 = vrot.slane %v2364_v27, 1 }
  0x92   : > { %891 = vrot.lane.b32.xlu0 %v620_v11, %s2079_s4  ;;  %v946_v29 = vsel %vm942_vm4, %v913_v24, %v642_v10  ;;  %v2351_v10 = vld [vmem:[%s2114_s17 + $0x90] sm:$0xff]  }
  0x93   : > { %576 = vrot.lane.b32.xlu1 %v485_v4, %s2075_s21  ;;  %v979_v35 = vsel %vm975_vm5, %v946_v29, %v679_v59  ;;  %v504_v59 = vor.u32 %v503_v51, %v499_v50  ;;  %v511_v19 = vshrl.u32 %v2351_v10, 16 }
  0x94   : > { %v724_v18 = vpop.permute.xlu0 %723 }
  0x95   : > { %v726_v22 = vpop.permute.xlu1 %725  ;;  %v1010_v1 = vsel %vm1008_vm6, %v977_v32, %v724_v18  ;;  %v627_v32 = vrot.slane %v2351_v10, 1 }
  0x96   : > { %655 = vrot.lane.b32.xlu0 %v617_v55, %s2074_s20  ;;  %v1043_v42 = vsel %vm1041_vm7, %v1010_v1, %v759_v2  ;;  %v1012_v43 = vsel %vm1008_vm6, %v979_v35, %v726_v22  ;;  %v628_v1 = vrot.slane %v2053_v15, 1 }
  0x97   : > { %657 = vrot.lane.b32.xlu1 %v620_v11, %s2074_s20  ;;  %v1045_v55 = vsel %vm1041_vm7, %v1012_v43, %v761_v16  ;;  %v513_v16 = vshll.u32 %v2351_v10, 16 }
  0x98   : > { %v796_v26 = vpop.permute.xlu0 %795 }
  0x99   : > { %v798_v31 = vpop.permute.xlu1 %797  ;;  %v1076_v44 = vsel %vm1074_vm8, %v1043_v42, %v796_v26  ;;  %v515_v20 = vrot.slane %v513_v16, 1  ;;  %v520_v26 = vrot.slane %v518_v21, 1  ;;  %v2057_v16 = vld [vmem:[%s2114_s17 + $0xb0] ss:$0 sps:$4 sm:$0x11]  }
  0x9a   : > { %692 = vrot.lane.b32.xlu0 %v2268_v48, %s2072_s18  ;;  %v1078_v56 = vsel %vm1074_vm8, %v1045_v55, %v798_v31 }
  0x9b   : > { %694 = vrot.lane.b32.xlu1 %v2293_v9, %s2072_s18  ;;  %v516_v25 = vor.u32 %v515_v20, %v511_v19 }
  0x9c   : > { %v843_v36 = vpop.permute.xlu0 %842 }
  0x9d   : > { %v845_v41 = vpop.permute.xlu1 %844  ;;  %v1109_v46 = vsel %vm1107_vm9, %v1076_v44, %v843_v36  ;;  %v521_v35 = vsel %vm365_vm1, %v516_v25, %v520_v26  ;;  %v2055_v36 = vld [vmem:[%s2114_s17 + $0xa4] ss:$0 sps:$4 sm:$0x11]   ;;  %v629_v44 = vsel %vm590_vm0, %v627_v32, %v628_v1 }
  0x9e   : > { %739 = vrot.lane.b32.xlu0 %v485_v4, %s2076_s22  ;;  %v1111_v57 = vsel %vm1107_vm9, %v1078_v56, %v845_v41  ;;  %v509_v4 = vsel %vm365_vm1, %v504_v59, %v508_v61  ;;  %v530_v51 = vshll.u32 %v2055_v36, 16  ;;  %v631_v7 = vrot.slane %v2055_v36, 1 }
  0x9f   : > { %741 = vrot.lane.b32.xlu1 %v497_v37, %s2076_s22 }
  0xa0   : > { %v878_v47 = vpop.permute.xlu0 %877  ;;  %v532_v61 = vrot.slane %v530_v51, 1 }
  0xa1   : > { %v563_v53 = vpop.permute.xlu1 %562  ;;  %v1142_v54 = vsel %vm1140_vm10, %v1109_v46, %v878_v47 }
  0xa2   : > { %774 = vrot.lane.b32.xlu0 %v620_v11, %s2073_s19  ;;  %1968 = vmatprep.mubr.msk.bf16.mxu0 %vm1193_vm11, %v1142_v54  ;;  %v915_v29 = vsel %vm909_vm3, %v2117_v0, %v563_v53 }
  0xa3   : > { %776 = vrot.lane.b32.xlu1 %v623_v45, %s2073_s19 }
  0xa4   : > { %v880_v58 = vpop.permute.xlu0 %879 }
  0xa5   : > { %v565_v62 = vpop.permute.xlu1 %564  ;;  %v1144_v63 = vsel %vm1140_vm10, %v1111_v57, %v880_v58 }
  0xa6   : > { %811 = vrot.lane.b32.xlu0 %v2293_v9, %s2077_s25  ;;  %1969 = vmatmul.mubr.msk.bf16.vlgmr.msra.gmra.mrb[0].mxu0 %vm1193_vm11, %v1144_v63  ;;  %v917_v40 = vsel %vm909_vm3, %v2146_v30, %v565_v62 }
  0xa7   : > { %813 = vrot.lane.b32.xlu1 %v2311_v28, %s2077_s25 }
  0xa8   : > { %v644_v2 = vpop.permute.xlu0 %643 }
  0xa9   : > { %v646_v5 = vpop.permute.xlu1 %645  ;;  %v948_v31 = vsel %vm942_vm4, %v915_v29, %v644_v2  ;;  %v2422_v29 = vld [vmem:[%s2114_s17 + $0xb4] sm:$0xff]  }
  0xaa   : > { %858 = vrot.lane.b32.xlu0 %v497_v37, %s2078_s28  ;;  %v950_v42 = vsel %vm942_vm4, %v917_v40, %v646_v5 }
  0xab   : > { %860 = vrot.lane.b32.xlu1 %v509_v4, %s2078_s28 }
  0xac   : > { %v681_v8 = vpop.permute.xlu0 %680 }
  0xad   : > { %v683_v11 = vpop.permute.xlu1 %682  ;;  %v981_v33 = vsel %vm975_vm5, %v948_v31, %v681_v8 }
  0xae   : > { %893 = vrot.lane.b32.xlu0 %v623_v45, %s2079_s4  ;;  %v983_v46 = vsel %vm975_vm5, %v950_v42, %v683_v11  ;;  %v2409_v11 = vld [vmem:[%s2114_s17 + $0xa8] sm:$0xff]  }
  0xaf   : > { %578 = vrot.lane.b32.xlu1 %v497_v37, %s2075_s21  ;;  %v525_v37 = vshll.u32 %v2364_v27, 16  ;;  %v535_v20 = vshrl.u32 %v2409_v11, 16 }
  0xb0   : > { %v728_v13 = vpop.permute.xlu0 %727 }
  0xb1   : > { %v730_v17 = vpop.permute.xlu1 %729  ;;  %v1014_v0 = vsel %vm1008_vm6, %v981_v33, %v728_v13  ;;  %v527_v30 = vrot.slane %v525_v37, 1  ;;  %v632_v13 = vsel %vm590_vm0, %v630_v6, %v631_v7  ;;  %v633_v33 = vrot.slane %v2409_v11, 1 }
  0xb2   : > { %895 = vrot.lane.b32.xlu0 %v626_v12, %s2079_s4  ;;  %v1016_v52 = vsel %vm1008_vm6, %v983_v46, %v730_v17  ;;  %v537_v17 = vshll.u32 %v2409_v11, 16  ;;  %v547_v46 = vshrl.u32 %v2422_v29, 16  ;;  %v636_v6 = vrot.slane %v2422_v29, 1 }
  0xb3   : > { %580 = vrot.lane.b32.xlu1 %v509_v4, %s2075_s21 }
  0xb4   : > { %v763_v18 = vpop.permute.xlu0 %762  ;;  %v539_v21 = vrot.slane %v537_v17, 1  ;;  %v2061_v17 = vld [vmem:[%s2114_s17 + $0xc8] ss:$0 sps:$4 sm:$0x11]  }
  0xb5   : > { %v765_v22 = vpop.permute.xlu1 %764  ;;  %v1047_v41 = vsel %vm1041_vm7, %v1014_v0, %v763_v18  ;;  %v2059_v0 = vld [vmem:[%s2114_s17 + $0xbc] ss:$0 sps:$4 sm:$0x11]  }
  0xb6   : > { %659 = vrot.lane.b32.xlu0 %v623_v45, %s2074_s20  ;;  %v523_v45 = vshrl.u32 %v2364_v27, 16  ;;  %v1049_v55 = vsel %vm1041_vm7, %v1016_v52, %v765_v22  ;;  %v542_v22 = vshll.u32 %v2057_v16, 16  ;;  %v540_v26 = vor.u32 %v539_v21, %v535_v20 }
  0xb7   : > { %661 = vrot.lane.b32.xlu1 %v626_v12, %s2074_s20  ;;  %v554_v51 = vshll.u32 %v2059_v0, 16  ;;  %v637_v7 = vrot.slane %v2059_v0, 1 }
  0xb8   : > { %v800_v24 = vpop.permute.xlu0 %799  ;;  %v528_v59 = vor.u32 %v527_v30, %v523_v45 }
  0xb9   : > { %v802_v3 = vpop.permute.xlu1 %801  ;;  %v1080_v43 = vsel %vm1074_vm8, %v1047_v41, %v800_v24 }
  0xba   : > { %696 = vrot.lane.b32.xlu0 %v2311_v28, %s2072_s18  ;;  %v1082_v56 = vsel %vm1074_vm8, %v1049_v55, %v802_v3  ;;  %v544_v3 = vrot.slane %v542_v22, 1 }
  0xbb   : > { %698 = vrot.lane.b32.xlu1 %v2351_v10, %s2072_s18 }
  0xbc   : > { %v847_v34 = vpop.permute.xlu0 %846  ;;  %v545_v37 = vsel %vm365_vm1, %v540_v26, %v544_v3 }
  0xbd   : > { %v849_v38 = vpop.permute.xlu1 %848  ;;  %v1113_v47 = vsel %vm1107_vm9, %v1080_v43, %v847_v34  ;;  %v634_v34 = vrot.slane %v2057_v16, 1 }
  0xbe   : > { %743 = vrot.lane.b32.xlu0 %v509_v4, %s2076_s22  ;;  %v1115_v57 = vsel %vm1107_vm9, %v1082_v56, %v849_v38  ;;  %v533_v4 = vsel %vm365_vm1, %v528_v59, %v532_v61  ;;  %v549_v38 = vshll.u32 %v2422_v29, 16  ;;  %v556_v61 = vrot.slane %v554_v51, 1 }
  0xbf   : > { %745 = vrot.lane.b32.xlu1 %v521_v35, %s2076_s22  ;;  %v635_v45 = vsel %vm590_vm0, %v633_v33, %v634_v34 }
  0xc0   : > { %v882_v50 = vpop.permute.xlu0 %881 }
  0xc1   : > { %v567_v53 = vpop.permute.xlu1 %566  ;;  %v1146_v54 = vsel %vm1140_vm10, %v1113_v47, %v882_v50 }
  0xc2   : > { %778 = vrot.lane.b32.xlu0 %v626_v12, %s2073_s19  ;;  %1972 = vmatprep.mubr.msk.bf16.mxu0 %vm1193_vm11, %v1146_v54  ;;  %v919_v32 = vsel %vm909_vm3, %v2176_v49, %v567_v53 }
  0xc3   : > { %780 = vrot.lane.b32.xlu1 %v629_v44, %s2073_s19 }
  0xc4   : > { %v884_v58 = vpop.permute.xlu0 %883 }
  0xc5   : > { %v569_v62 = vpop.permute.xlu1 %568  ;;  %v1148_v63 = vsel %vm1140_vm10, %v1115_v57, %v884_v58 }
  0xc6   : > { %815 = vrot.lane.b32.xlu0 %v2351_v10, %s2077_s25  ;;  %1973 = vmatmul.mubr.msk.bf16.gmra.mrb[4].mxu0 %vm1193_vm11, %v1148_v63  ;;  %v921_v41 = vsel %vm909_vm3, %v2192_v60, %v569_v62  ;;  %v551_v60 = vrot.slane %v549_v38, 1 }
  0xc7   : > { %817 = vrot.lane.b32.xlu1 %v2364_v27, %s2077_s25 }
  0xc8   : > { %v648_v2 = vpop.permute.xlu0 %647  ;;  %v552_v59 = vor.u32 %v551_v60, %v547_v46 }
  0xc9   : > { %v650_v5 = vpop.permute.xlu1 %649  ;;  %v952_v1 = vsel %vm942_vm4, %v919_v32, %v648_v2  ;;  %v2062_v32 = vld [vmem:[%s2114_s17 + $0xcc] sm:$0xff]  }
  0xca   : > { %862 = vrot.lane.b32.xlu0 %v521_v35, %s2078_s28  ;;  %v954_v43 = vsel %vm942_vm4, %v921_v41, %v650_v5 }
  0xcb   : > { %864 = vrot.lane.b32.xlu1 %v533_v4, %s2078_s28 }
  0xcc   : > { %v685_v8 = vpop.permute.xlu0 %684 }
  0xcd   : > { %v687_v12 = vpop.permute.xlu1 %686 }
  0xce   : > { %897 = vrot.lane.b32.xlu0 %v629_v44, %s2079_s4  ;;  %v987_v47 = vsel %vm975_vm5, %v954_v43, %v687_v12  ;;  %v2467_v12 = vld [vmem:[%s2114_s17 + $0xc0] sm:$0xff]  }
  0xcf   : > { %582 = vrot.lane.b32.xlu1 %v521_v35, %s2075_s21  ;;  %v985_v35 = vsel %vm975_vm5, %v952_v1, %v685_v8  ;;  %v712_v21 = vshrl.u32 %v2467_v12, 16 }
  0xd0   : > { %v732_v15 = vpop.permute.xlu0 %731 }
  0xd1   : > { %v734_v18 = vpop.permute.xlu1 %733  ;;  %v1018_v49 = vsel %vm1008_vm6, %v985_v35, %v732_v15  ;;  %v638_v15 = vsel %vm590_vm0, %v636_v6, %v637_v7  ;;  %v755_v35 = vrot.slane %v2467_v12, 1 }
  0xd2   : > { %899 = vrot.lane.b32.xlu0 %v632_v13, %s2079_s4  ;;  %v1020_v52 = vsel %vm1008_vm6, %v987_v47, %v734_v18  ;;  %v714_v18 = vshll.u32 %v2467_v12, 16  ;;  %v831_v47 = vshrl.u32 %v2062_v32, 16 }
  0xd3   : > { %584 = vrot.lane.b32.xlu1 %v533_v4, %s2075_s21 }
  0xd4   : > { %v767_v19 = vpop.permute.xlu0 %766  ;;  %v716_v22 = vrot.slane %v714_v18, 1 }
  0xd5   : > { %v769_v24 = vpop.permute.xlu1 %768  ;;  %v1051_v42 = vsel %vm1041_vm7, %v1018_v49, %v767_v19  ;;  %v2063_v49 = vld [vmem:[%s2114_s17 + $0xd4] ss:$0 sps:$4 sm:$0x11]  }
  0xd6   : > { %663 = vrot.lane.b32.xlu0 %v629_v44, %s2074_s20  ;;  %v1053_v55 = vsel %vm1041_vm7, %v1020_v52, %v769_v24  ;;  %v719_v24 = vshll.u32 %v2061_v17, 16  ;;  %v717_v3 = vor.u32 %v716_v22, %v712_v21  ;;  %v875_v6 = vrot.slane %v2063_v49, 1 }
  0xd7   : > { %665 = vrot.lane.b32.xlu1 %v632_v13, %s2074_s20 }
  0xd8   : > { %v804_v25 = vpop.permute.xlu0 %803 }
  0xd9   : > { %v806_v31 = vpop.permute.xlu1 %805  ;;  %v1084_v44 = vsel %vm1074_vm8, %v1051_v42, %v804_v25 }
  0xda   : > { %700 = vrot.lane.b32.xlu0 %v2364_v27, %s2072_s18  ;;  %v1086_v56 = vsel %vm1074_vm8, %v1053_v55, %v806_v31  ;;  %v721_v31 = vrot.slane %v719_v24, 1 }
  0xdb   : > { %702 = vrot.lane.b32.xlu1 %v2409_v11, %s2072_s18 }
  0xdc   : > { %v851_v36 = vpop.permute.xlu0 %850  ;;  %v722_v38 = vsel %vm365_vm1, %v717_v3, %v721_v31 }
  0xdd   : > { %v853_v40 = vpop.permute.xlu1 %852  ;;  %v1117_v50 = vsel %vm1107_vm9, %v1084_v44, %v851_v36  ;;  %v756_v36 = vrot.slane %v2061_v17, 1 }
  0xde   : > { %747 = vrot.lane.b32.xlu0 %v533_v4, %s2076_s22  ;;  %v1119_v57 = vsel %vm1107_vm9, %v1086_v56, %v853_v40  ;;  %v557_v4 = vsel %vm365_vm1, %v552_v59, %v556_v61  ;;  %v833_v40 = vshll.u32 %v2062_v32, 16 }
  0xdf   : > { %749 = vrot.lane.b32.xlu1 %v545_v37, %s2076_s22  ;;  %v757_v46 = vsel %vm590_vm0, %v755_v35, %v756_v36 }
  0xe0   : > { %v886_v30 = vpop.permute.xlu0 %885  ;;  %v835_v51 = vrot.slane %v833_v40, 1 }
  0xe1   : > { %v571_v53 = vpop.permute.xlu1 %570  ;;  %v1150_v54 = vsel %vm1140_vm10, %v1117_v50, %v886_v30 }
  0xe2   : > { %782 = vrot.lane.b32.xlu0 %v632_v13, %s2073_s19  ;;  %1976 = vmatprep.mubr.msk.bf16.mxu0 %vm1193_vm11, %v1150_v54  ;;  %v923_v33 = vsel %vm909_vm3, %v2217_v14, %v571_v53  ;;  %v836_v59 = vor.u32 %v835_v51, %v831_v47 }
  0xe3   : > { %784 = vrot.lane.b32.xlu1 %v635_v45, %s2073_s19 }
  0xe4   : > { %v888_v58 = vpop.permute.xlu0 %887 }
  0xe5   : > { %v573_v62 = vpop.permute.xlu1 %572  ;;  %v1152_v63 = vsel %vm1140_vm10, %v1119_v57, %v888_v58 }
  0xe6   : > { %819 = vrot.lane.b32.xlu0 %v2409_v11, %s2077_s25  ;;  %1977 = vmatmul.mubr.msk.bf16.gmra.mrb[8].mxu0 %vm1193_vm11, %v1152_v63  ;;  %v925_v42 = vsel %vm909_vm3, %v2230_v23, %v573_v62  ;;  %v838_v23 = vshll.u32 %v2063_v49, 16 }
  0xe7   : > { %821 = vrot.lane.b32.xlu1 %v2422_v29, %s2077_s25 }
  0xe8   : > { %v652_v2 = vpop.permute.xlu0 %651  ;;  %v840_v61 = vrot.slane %v838_v23, 1 }
  0xe9   : > { %v654_v5 = vpop.permute.xlu1 %653  ;;  %v956_v34 = vsel %vm942_vm4, %v923_v33, %v652_v2 }
  0xea   : > { %866 = vrot.lane.b32.xlu0 %v545_v37, %s2078_s28  ;;  %v958_v44 = vsel %vm942_vm4, %v925_v42, %v654_v5  ;;  %v874_v5 = vrot.slane %v2062_v32, 1 }
  0xeb   : > { %868 = vrot.lane.b32.xlu1 %v557_v4, %s2078_s28 }
  0xec   : > { %v689_v8 = vpop.permute.xlu0 %688 }
  0xed   : > { %v691_v13 = vpop.permute.xlu1 %690 }
  0xee   : > { %901 = vrot.lane.b32.xlu0 %v635_v45, %s2079_s4  ;;  %v991_v50 = vsel %vm975_vm5, %v958_v44, %v691_v13  ;;  %v876_v13 = vsel %vm590_vm0, %v874_v5, %v875_v6 }
  0xef   : > { %586 = vrot.lane.b32.xlu1 %v545_v37, %s2075_s21  ;;  %v989_v37 = vsel %vm975_vm5, %v956_v34, %v689_v8 }
  0xf0   : > { %v736_v16 = vpop.permute.xlu0 %735 }
  0xf1   : > { %v738_v19 = vpop.permute.xlu1 %737  ;;  %v1022_v14 = vsel %vm1008_vm6, %v989_v37, %v736_v16 }
  0xf2   : > { %903 = vrot.lane.b32.xlu0 %v638_v15, %s2079_s4  ;;  %v1024_v52 = vsel %vm1008_vm6, %v991_v50, %v738_v19 }
  0xf3   : > { %588 = vrot.lane.b32.xlu1 %v557_v4, %s2075_s21 }
  0xf4   : > { %v771_v20 = vpop.permute.xlu0 %770 }
  0xf5   : > { %v773_v25 = vpop.permute.xlu1 %772  ;;  %v1055_v43 = vsel %vm1041_vm7, %v1022_v14, %v771_v20 }
  0xf6   : > { %667 = vrot.lane.b32.xlu0 %v635_v45, %s2074_s20  ;;  %v1057_v55 = vsel %vm1041_vm7, %v1024_v52, %v773_v25 }
  0xf7   : > { %669 = vrot.lane.b32.xlu1 %v638_v15, %s2074_s20 }
  0xf8   : > { %v808_v26 = vpop.permute.xlu0 %807 }
  0xf9   : > { %v810_v1 = vpop.permute.xlu1 %809  ;;  %v1088_v45 = vsel %vm1074_vm8, %v1055_v43, %v808_v26 }
  0xfa   : > { %704 = vrot.lane.b32.xlu0 %v2422_v29, %s2072_s18  ;;  %v1090_v56 = vsel %vm1074_vm8, %v1057_v55, %v810_v1 }
  0xfb   : > { %706 = vrot.lane.b32.xlu1 %v2467_v12, %s2072_s18 }
  0xfc   : > { %v855_v0 = vpop.permute.xlu0 %854 }
  0xfd   : > { %v857_v41 = vpop.permute.xlu1 %856  ;;  %v1121_v30 = vsel %vm1107_vm9, %v1088_v45, %v855_v0 }
  0xfe   : > { %751 = vrot.lane.b32.xlu0 %v557_v4, %s2076_s22  ;;  %v1123_v57 = vsel %vm1107_vm9, %v1090_v56, %v857_v41  ;;  %v841_v4 = vsel %vm365_vm1, %v836_v59, %v840_v61 }
  0xff   : > { %753 = vrot.lane.b32.xlu1 %v722_v38, %s2076_s22 }
 0x100   : > { %v890_v60 = vpop.permute.xlu0 %889 }
 0x101   : > { %v575_v53 = vpop.permute.xlu1 %574  ;;  %v1154_v54 = vsel %vm1140_vm10, %v1121_v30, %v890_v60 }
 0x102   : > { %786 = vrot.lane.b32.xlu0 %v638_v15, %s2073_s19  ;;  %1980 = vmatprep.mubr.msk.bf16.mxu0 %vm1193_vm11, %v1154_v54  ;;  %v927_v21 = vsel %vm909_vm3, %v2255_v39, %v575_v53 }
 0x103   : > { %788 = vrot.lane.b32.xlu1 %v757_v46, %s2073_s19 }
 0x104   : > { %v892_v58 = vpop.permute.xlu0 %891 }
 0x105   : > { %v577_v62 = vpop.permute.xlu1 %576  ;;  %v1156_v63 = vsel %vm1140_vm10, %v1123_v57, %v892_v58 }
 0x106   : > { %823 = vrot.lane.b32.xlu0 %v2467_v12, %s2077_s25  ;;  %1981 = vmatmul.mubr.msk.bf16.gmra.mrb[12].mxu0 %vm1193_vm11, %v1156_v63  ;;  %v929_v31 = vsel %vm909_vm3, %v2268_v48, %v577_v62 }
 0x107   : > { %825 = vrot.lane.b32.xlu1 %v2062_v32, %s2077_s25 }
 0x108   : > { %v656_v2 = vpop.permute.xlu0 %655 }
 0x109   : > { %v658_v7 = vpop.permute.xlu1 %657  ;;  %v960_v22 = vsel %vm942_vm4, %v927_v21, %v656_v2 }
 0x10a   : > { %870 = vrot.lane.b32.xlu0 %v722_v38, %s2078_s28  ;;  %v962_v1 = vsel %vm942_vm4, %v929_v31, %v658_v7 }
 0x10b   : > { %872 = vrot.lane.b32.xlu1 %v841_v4, %s2078_s28 }
 0x10c   : > { %v693_v8 = vpop.permute.xlu0 %692 }
 0x10d   : > { %v695_v15 = vpop.permute.xlu1 %694  ;;  %v993_v24 = vsel %vm975_vm5, %v960_v22, %v693_v8 }
 0x10e   : > { %905 = vrot.lane.b32.xlu0 %v757_v46, %s2079_s4  ;;  %v995_v34 = vsel %vm975_vm5, %v962_v1, %v695_v15 }
 0x10f   : > { %907 = vrot.lane.b32.xlu1 %v876_v13, %s2079_s4 }
 0x110   : > { %v740_v12 = vpop.permute.xlu0 %739 }
 0x111   : > { %v742_v16 = vpop.permute.xlu1 %741  ;;  %v1026_v26 = vsel %vm1008_vm6, %v993_v24, %v740_v12 }
 0x112   : > { %v1028_v36 = vsel %vm1008_vm6, %v995_v34, %v742_v16 }
 0x114   : > { %v775_v17 = vpop.permute.xlu0 %774 }
 0x115   : > { %v777_v18 = vpop.permute.xlu1 %776  ;;  %v1059_v32 = vsel %vm1041_vm7, %v1026_v26, %v775_v17 }
 0x116   : > { %v1061_v38 = vsel %vm1041_vm7, %v1028_v36, %v777_v18 }
 0x118   : > { %v812_v19 = vpop.permute.xlu0 %811 }
 0x119   : > { %v814_v20 = vpop.permute.xlu1 %813  ;;  %v1092_v33 = vsel %vm1074_vm8, %v1059_v32, %v812_v19 }
 0x11a   : > { %v1094_v48 = vsel %vm1074_vm8, %v1061_v38, %v814_v20 }
 0x11c   : > { %v859_v25 = vpop.permute.xlu0 %858 }
 0x11d   : > { %v861_v3 = vpop.permute.xlu1 %860  ;;  %v1125_v39 = vsel %vm1107_vm9, %v1092_v33, %v859_v25 }
 0x11e   : > { %v1127_v49 = vsel %vm1107_vm9, %v1094_v48, %v861_v3 }
 0x120   : > { %v894_v35 = vpop.permute.xlu0 %893 }
 0x121   : > { %v579_v37 = vpop.permute.xlu1 %578  ;;  %v1158_v0 = vsel %vm1140_vm10, %v1125_v39, %v894_v35 }
 0x122   : > { %1984 = vmatprep.mubr.msk.bf16.mxu1 %vm1193_vm11, %v1158_v0  ;;  %v931_v23 = vsel %vm909_vm3, %v2293_v9, %v579_v37 }
 0x124   : > { %v896_v40 = vpop.permute.xlu0 %895 }
 0x125   : > { %v581_v14 = vpop.permute.xlu1 %580  ;;  %v1160_v41 = vsel %vm1140_vm10, %v1127_v49, %v896_v40 }
 0x126   : > { %1985 = vmatmul.mubr.msk.bf16.vlgmr.msra.gmra.mrb[0].mxu1 %vm1193_vm11, %v1160_v41  ;;  %v933_v57 = vsel %vm909_vm3, %v2311_v28, %v581_v14 }
 0x128   : > { %v660_v42 = vpop.permute.xlu0 %659 }
 0x129   : > { %v662_v43 = vpop.permute.xlu1 %661  ;;  %v964_v52 = vsel %vm942_vm4, %v931_v23, %v660_v42 }
 0x12a   : > { %v966_v59 = vsel %vm942_vm4, %v933_v57, %v662_v43 }
 0x12c   : > { %v697_v44 = vpop.permute.xlu0 %696 }
 0x12d   : > { %v699_v45 = vpop.permute.xlu1 %698  ;;  %v997_v53 = vsel %vm975_vm5, %v964_v52, %v697_v44 }
 0x12e   : > { %v999_v62 = vsel %vm975_vm5, %v966_v59, %v699_v45 }
 0x130   : > { %v744_v46 = vpop.permute.xlu0 %743 }
 0x131   : > { %v746_v47 = vpop.permute.xlu1 %745  ;;  %v1030_v55 = vsel %vm1008_vm6, %v997_v53, %v744_v46 }
 0x132   : > { %v1032_v2 = vsel %vm1008_vm6, %v999_v62, %v746_v47 }
 0x134   : > { %v779_v50 = vpop.permute.xlu0 %778 }
 0x135   : > { %v781_v30 = vpop.permute.xlu1 %780  ;;  %v1063_v58 = vsel %vm1041_vm7, %v1030_v55, %v779_v50 }
 0x136   : > { %v1065_v6 = vsel %vm1041_vm7, %v1032_v2, %v781_v30 }
 0x138   : > { %v816_v60 = vpop.permute.xlu0 %815 }
 0x139   : > { %v818_v51 = vpop.permute.xlu1 %817  ;;  %v1096_v61 = vsel %vm1074_vm8, %v1063_v58, %v816_v60 }
 0x13a   : > { %v1098_v28 = vsel %vm1074_vm8, %v1065_v6, %v818_v51 }
 0x13c   : > { %v863_v54 = vpop.permute.xlu0 %862 }
 0x13d   : > { %v865_v56 = vpop.permute.xlu1 %864  ;;  %v1129_v9 = vsel %vm1107_vm9, %v1096_v61, %v863_v54 }
 0x13e   : > { %v1131_v7 = vsel %vm1107_vm9, %v1098_v28, %v865_v56 }
 0x140   : > { %v898_v63 = vpop.permute.xlu0 %897 }
 0x141   : > { %v583_v4 = vpop.permute.xlu1 %582  ;;  %v1162_v5 = vsel %vm1140_vm10, %v1129_v9, %v898_v63 }
 0x142   : > { %1988 = vmatprep.mubr.msk.bf16.mxu1 %vm1193_vm11, %v1162_v5  ;;  %v935_v26 = vsel %vm909_vm3, %v2351_v10, %v583_v4 }
 0x144   : > { %v900_v8 = vpop.permute.xlu0 %899 }
 0x145   : > { %v585_v13 = vpop.permute.xlu1 %584  ;;  %v1164_v15 = vsel %vm1140_vm10, %v1131_v7, %v900_v8 }
 0x146   : > { %1989 = vmatmul.mubr.msk.bf16.gmra.mrb[4].mxu1 %vm1193_vm11, %v1164_v15  ;;  %v937_v34 = vsel %vm909_vm3, %v2364_v27, %v585_v13 }
 0x148   : > { %v664_v12 = vpop.permute.xlu0 %663 }
 0x149   : > { %v666_v16 = vpop.permute.xlu1 %665  ;;  %v968_v3 = vsel %vm942_vm4, %v935_v26, %v664_v12 }
 0x14a   : > { %v970_v35 = vsel %vm942_vm4, %v937_v34, %v666_v16 }
 0x14c   : > { %v701_v17 = vpop.permute.xlu0 %700 }
 0x14d   : > { %v703_v18 = vpop.permute.xlu1 %702  ;;  %v1001_v31 = vsel %vm975_vm5, %v968_v3, %v701_v17 }
 0x14e   : > { %v1003_v37 = vsel %vm975_vm5, %v970_v35, %v703_v18 }
 0x150   : > { %v748_v19 = vpop.permute.xlu0 %747 }
 0x151   : > { %v750_v20 = vpop.permute.xlu1 %749  ;;  %v1034_v1 = vsel %vm1008_vm6, %v1001_v31, %v748_v19 }
 0x152   : > { %v1036_v38 = vsel %vm1008_vm6, %v1003_v37, %v750_v20 }
 0x154   : > { %v783_v21 = vpop.permute.xlu0 %782 }
 0x155   : > { %v785_v22 = vpop.permute.xlu1 %784  ;;  %v1067_v39 = vsel %vm1041_vm7, %v1034_v1, %v783_v21 }
 0x156   : > { %v1069_v40 = vsel %vm1041_vm7, %v1036_v38, %v785_v22 }
 0x158   : > { %v820_v24 = vpop.permute.xlu0 %819 }
 0x159   : > { %v822_v25 = vpop.permute.xlu1 %821  ;;  %v1100_v36 = vsel %vm1074_vm8, %v1067_v39, %v820_v24 }
 0x15a   : > { %v1102_v27 = vsel %vm1074_vm8, %v1069_v40, %v822_v25 }
 0x15c   : > { %v867_v32 = vpop.permute.xlu0 %866 }
 0x15d   : > { %v869_v33 = vpop.permute.xlu1 %868  ;;  %v1133_v10 = vsel %vm1107_vm9, %v1100_v36, %v867_v32 }
 0x15e   : > { %v1135_v14 = vsel %vm1107_vm9, %v1102_v27, %v869_v33 }
 0x160   : > { %v902_v0 = vpop.permute.xlu0 %901 }
 0x161   : > { %v587_v48 = vpop.permute.xlu1 %586  ;;  %v1166_v49 = vsel %vm1140_vm10, %v1133_v10, %v902_v0 }
 0x162   : > { %1992 = vmatprep.mubr.msk.bf16.mxu1 %vm1193_vm11, %v1166_v49  ;;  %v939_v23 = vsel %vm909_vm3, %v2409_v11, %v587_v48 }
 0x164   : > { %v904_v41 = vpop.permute.xlu0 %903 }
 0x165   : > { %v589_v42 = vpop.permute.xlu1 %588  ;;  %v1168_v43 = vsel %vm1140_vm10, %v1135_v14, %v904_v41 }
 0x166   : > { %1993 = vmatmul.mubr.msk.bf16.gmra.mrb[8].mxu1 %vm1193_vm11, %v1168_v43  ;;  %v941_v53 = vsel %vm909_vm3, %v2422_v29, %v589_v42 }
 0x168   : > { %v668_v44 = vpop.permute.xlu0 %667 }
 0x169   : > { %v670_v45 = vpop.permute.xlu1 %669  ;;  %v972_v54 = vsel %vm942_vm4, %v939_v23, %v668_v44 }
 0x16a   : > { %v974_v57 = vsel %vm942_vm4, %v941_v53, %v670_v45 }
 0x16c   : > { %v705_v46 = vpop.permute.xlu0 %704 }
 0x16d   : > { %v707_v47 = vpop.permute.xlu1 %706  ;;  %v1005_v11 = vsel %vm975_vm5, %v972_v54, %v705_v46 }
 0x16e   : > { %v1007_v29 = vsel %vm975_vm5, %v974_v57, %v707_v47 }
 0x170   : > { %v752_v50 = vpop.permute.xlu0 %751 }
 0x171   : > { %v754_v30 = vpop.permute.xlu1 %753  ;;  %v1038_v61 = vsel %vm1008_vm6, %v1005_v11, %v752_v50 }
 0x172   : > { %v1040_v2 = vsel %vm1008_vm6, %v1007_v29, %v754_v30 }
 0x174   : > { %v787_v60 = vpop.permute.xlu0 %786 }
 0x175   : > { %v789_v51 = vpop.permute.xlu1 %788  ;;  %v1071_v4 = vsel %vm1041_vm7, %v1038_v61, %v787_v60 }
 0x176   : > { %v1073_v17 = vsel %vm1041_vm7, %v1040_v2, %v789_v51 }
 0x178   : > { %v824_v52 = vpop.permute.xlu0 %823 }
 0x179   : > { %v826_v55 = vpop.permute.xlu1 %825  ;;  %v1970_v56 = vpop.f32.mrb[0].mxu0  ;;  %v1104_v18 = vsel %vm1074_vm8, %v1071_v4, %v824_v52 }
 0x17a   : > { %v1913_v58 = vpack.c.bf16 %v1970_v56, %v1970_v56  ;;  %v1264_v59 = vpop.f32.mrb[1].mxu0  ;;  %v1623_v5 = vmul.f32 %v1970_v56, %v1970_v56  ;;  %v1555_v20 = vsel %vm909_vm3, %v1970_v56, 0.0  ;;  %v1106_v25 = vsel %vm1074_vm8, %v1073_v17, %v826_v55 }
 0x17b   : > { %v1911_v62 = vpack.c.bf16 %v1264_v59, %v1264_v59  ;;  %v1621_v9 = vmul.f32 %v1264_v59, %v1264_v59  ;;  %v1971_v63 = vpop.f32.mrb[2].mxu0  ;;  %v1552_v8 = vsel %vm909_vm3, %v1264_v59, 0.0 }
 0x17c   : > { %1522 = vst.msk [vmem:[%s2590_s8 + $0x8] sm:$0xf] %vm1519_vm12, %v1913_v58  ;;  %v1914_v6 = vpack.c.bf16 %v1971_v63, %v1971_v63  ;;  %v1267_v28 = vpop.f32.mrb[3].mxu0  ;;  %v871_v7 = vpop.permute.xlu0 %870  ;;  %v1624_v22 = vmul.f32 %v1971_v63, %v1971_v63  ;;  %v1656_v1 = vsel %vm909_vm3, %v1623_v5, 0.0  ;;  %v1557_v33 = vsel %vm909_vm3, %v1971_v63, 0.0 }
 0x17d   : > { %1520 = vst.msk [vmem:[%s2590_s8] sm:$0xf] %vm1519_vm12, %v1911_v62  ;;  %v873_v13 = vpop.permute.xlu1 %872  ;;  %v1912_v15 = vpack.c.bf16 %v1267_v28, %v1267_v28  ;;  %v1553_v12 = vsel %vm909_vm3, %v1267_v28, 0.0  ;;  %v1622_v16 = vmul.f32 %v1267_v28, %v1267_v28  ;;  %v1653_v21 = vsel %vm909_vm3, %v1621_v9, 0.0 }
 0x17e   : > { %1523 = vst.msk [vmem:[%s2590_s8 + $0xc] sm:$0xf] %vm1519_vm12, %v1914_v6  ;;  %v1554_v19 = vadd.f32 %v1553_v12, %v1552_v8  ;;  %v1137_v31 = vsel %vm1107_vm9, %v1104_v18, %v871_v7  ;;  %v1139_v34 = vsel %vm1107_vm9, %v1106_v25, %v873_v13  ;;  %v1658_v0 = vsel %vm909_vm3, %v1624_v22, 0.0 }
 0x17f   : > { %1521 = vst.msk [vmem:[%s2590_s8 + $0x4] sm:$0xf] %vm1519_vm12, %v1912_v15  ;;  %v1654_v24 = vsel %vm909_vm3, %v1622_v16, 0.0 }
 0x180   : > { %v1556_v26 = vadd.f32 %v1555_v20, %v1554_v19  ;;  %v1655_v3 = vadd.f32 %v1654_v24, %v1653_v21  ;;  %v906_v32 = vpop.permute.xlu0 %905 }
 0x181   : > { %v908_v39 = vpop.permute.xlu1 %907  ;;  %v1170_v35 = vsel %vm1140_vm10, %v1137_v31, %v906_v32 }
 0x182   : > { %v1657_v36 = vadd.f32 %v1656_v1, %v1655_v3  ;;  %v1172_v37 = vsel %vm1140_vm10, %v1139_v34, %v908_v39  ;;  %1996 = vmatprep.mubr.msk.bf16.mxu1 %vm1193_vm11, %v1170_v35  ;;  %v1558_v10 = vadd.f32 %v1557_v33, %v1556_v26 }
 0x183   : > { %1997 = vmatmul.mubr.msk.bf16.gmra.mrb[12].mxu1 %vm1193_vm11, %v1172_v37 }
 0x184   : > { %v1659_v38 = vadd.f32 %v1658_v0, %v1657_v36 }
 0x199   : > { %v1974_v48 = vpop.f32.mrb[4].mxu0 }
 0x19a   : > { %v1917_v49 = vpack.c.bf16 %v1974_v48, %v1974_v48  ;;  %v1280_v40 = vpop.f32.mrb[5].mxu0  ;;  %v1627_v30 = vmul.f32 %v1974_v48, %v1974_v48  ;;  %v1563_v52 = vsel %vm909_vm3, %v1974_v48, 0.0 }
 0x19b   : > { %v1915_v27 = vpack.c.bf16 %v1280_v40, %v1280_v40  ;;  %v1559_v14 = vsel %vm909_vm3, %v1280_v40, 0.0  ;;  %v1625_v41 = vmul.f32 %v1280_v40, %v1280_v40  ;;  %v1975_v42 = vpop.f32.mrb[6].mxu0 }
 0x19c   : > { %1526 = vst.msk [vmem:[%s2590_s8 + $0x18] sm:$0xf] %vm1519_vm12, %v1917_v49  ;;  %v1560_v43 = vadd.f32 %v1559_v14, %v1558_v10  ;;  %v1918_v44 = vpack.c.bf16 %v1975_v42, %v1975_v42  ;;  %v1283_v45 = vpop.f32.mrb[7].mxu0  ;;  %v1628_v53 = vmul.f32 %v1975_v42, %v1975_v42  ;;  %v1565_v56 = vsel %vm909_vm3, %v1975_v42, 0.0 }
 0x19d   : > { %1524 = vst.msk [vmem:[%s2590_s8 + $0x10] sm:$0xf] %vm1519_vm12, %v1915_v27  ;;  %v1660_v46 = vsel %vm909_vm3, %v1625_v41, 0.0  ;;  %v1916_v47 = vpack.c.bf16 %v1283_v45, %v1283_v45  ;;  %v1561_v50 = vsel %vm909_vm3, %v1283_v45, 0.0  ;;  %v1626_v23 = vmul.f32 %v1283_v45, %v1283_v45 }
 0x19e   : > { %v1661_v60 = vadd.f32 %v1660_v46, %v1659_v38  ;;  %1527 = vst.msk [vmem:[%s2590_s8 + $0x1c] sm:$0xf] %vm1519_vm12, %v1918_v44  ;;  %v1562_v51 = vadd.f32 %v1561_v50, %v1560_v43  ;;  %v1664_v11 = vsel %vm909_vm3, %v1627_v30, 0.0  ;;  %v1666_v29 = vsel %vm909_vm3, %v1628_v53, 0.0 }
 0x19f   : > { %1525 = vst.msk [vmem:[%s2590_s8 + $0x14] sm:$0xf] %vm1519_vm12, %v1916_v47  ;;  %v1662_v55 = vsel %vm909_vm3, %v1626_v23, 0.0 }
 0x1a0   : > { %v1564_v54 = vadd.f32 %v1563_v52, %v1562_v51  ;;  %v1663_v57 = vadd.f32 %v1662_v55, %v1661_v60 }
 0x1a2   : > { %v1566_v58 = vadd.f32 %v1565_v56, %v1564_v54  ;;  %v1665_v59 = vadd.f32 %v1664_v11, %v1663_v57 }
 0x1a4   : > { %v1667_v61 = vadd.f32 %v1666_v29, %v1665_v59 }
 0x1b9   : > { %v1978_v62 = vpop.f32.mrb[8].mxu0 }
 0x1ba   : > { %v1921_v9 = vpack.c.bf16 %v1978_v62, %v1978_v62  ;;  %v1296_v63 = vpop.f32.mrb[9].mxu0  ;;  %v1631_v16 = vmul.f32 %v1978_v62, %v1978_v62  ;;  %v1571_v20 = vsel %vm909_vm3, %v1978_v62, 0.0 }
 0x1bb   : > { %v1919_v2 = vpack.c.bf16 %v1296_v63, %v1296_v63  ;;  %v1567_v4 = vsel %vm909_vm3, %v1296_v63, 0.0  ;;  %v1629_v5 = vmul.f32 %v1296_v63, %v1296_v63  ;;  %v1979_v6 = vpop.f32.mrb[10].mxu0 }
 0x1bc   : > { %1530 = vst.msk [vmem:[%s2590_s8 + $0x28] sm:$0xf] %vm1519_vm12, %v1921_v9  ;;  %v1568_v28 = vadd.f32 %v1567_v4, %v1566_v58  ;;  %v1922_v7 = vpack.c.bf16 %v1979_v6, %v1979_v6  ;;  %v1299_v8 = vpop.f32.mrb[11].mxu0  ;;  %v1632_v21 = vmul.f32 %v1979_v6, %v1979_v6  ;;  %v1573_v25 = vsel %vm909_vm3, %v1979_v6, 0.0 }
 0x1bd   : > { %1528 = vst.msk [vmem:[%s2590_s8 + $0x20] sm:$0xf] %vm1519_vm12, %v1919_v2  ;;  %v1668_v13 = vsel %vm909_vm3, %v1629_v5, 0.0  ;;  %v1920_v15 = vpack.c.bf16 %v1299_v8, %v1299_v8  ;;  %v1569_v12 = vsel %vm909_vm3, %v1299_v8, 0.0  ;;  %v1630_v19 = vmul.f32 %v1299_v8, %v1299_v8 }
 0x1be   : > { %v1669_v17 = vadd.f32 %v1668_v13, %v1667_v61  ;;  %1531 = vst.msk [vmem:[%s2590_s8 + $0x2c] sm:$0xf] %vm1519_vm12, %v1922_v7  ;;  %v1570_v18 = vadd.f32 %v1569_v12, %v1568_v28  ;;  %v1672_v3 = vsel %vm909_vm3, %v1631_v16, 0.0  ;;  %v1674_v1 = vsel %vm909_vm3, %v1632_v21, 0.0 }
 0x1bf   : > { %1529 = vst.msk [vmem:[%s2590_s8 + $0x24] sm:$0xf] %vm1519_vm12, %v1920_v15  ;;  %v1670_v24 = vsel %vm909_vm3, %v1630_v19, 0.0 }
 0x1c0   : > { %v1572_v22 = vadd.f32 %v1571_v20, %v1570_v18  ;;  %v1671_v26 = vadd.f32 %v1670_v24, %v1669_v17 }
 0x1c2   : > { %v1574_v31 = vadd.f32 %v1573_v25, %v1572_v22  ;;  %v1673_v32 = vadd.f32 %v1672_v3, %v1671_v26 }
 0x1c4   : > { %v1675_v33 = vadd.f32 %v1674_v1, %v1673_v32 }
 0x1d9   : > { %v1982_v34 = vpop.f32.mrb[12].mxu0 }
 0x1da   : > { %v1925_v39 = vpack.c.bf16 %v1982_v34, %v1982_v34  ;;  %v1312_v35 = vpop.f32.mrb[13].mxu0  ;;  %v1635_v41 = vmul.f32 %v1982_v34, %v1982_v34  ;;  %v1579_v45 = vsel %vm909_vm3, %v1982_v34, 0.0 }
 0x1db   : > { %v1923_v36 = vpack.c.bf16 %v1312_v35, %v1312_v35  ;;  %v1575_v37 = vsel %vm909_vm3, %v1312_v35, 0.0  ;;  %v1633_v10 = vmul.f32 %v1312_v35, %v1312_v35  ;;  %v1983_v0 = vpop.f32.mrb[14].mxu0 }
 0x1dc   : > { %1534 = vst.msk [vmem:[%s2590_s8 + $0x38] sm:$0xf] %vm1519_vm12, %v1925_v39  ;;  %v1576_v38 = vadd.f32 %v1575_v37, %v1574_v31  ;;  %v1926_v48 = vpack.c.bf16 %v1983_v0, %v1983_v0  ;;  %v1315_v49 = vpop.f32.mrb[15].mxu0  ;;  %v1636_v46 = vmul.f32 %v1983_v0, %v1983_v0  ;;  %v1581_v30 = vsel %vm909_vm3, %v1983_v0, 0.0 }
 0x1dd   : > { %1532 = vst.msk [vmem:[%s2590_s8 + $0x30] sm:$0xf] %vm1519_vm12, %v1923_v36  ;;  %v1676_v40 = vsel %vm909_vm3, %v1633_v10, 0.0  ;;  %v1924_v27 = vpack.c.bf16 %v1315_v49, %v1315_v49  ;;  %v1577_v14 = vsel %vm909_vm3, %v1315_v49, 0.0  ;;  %v1634_v44 = vmul.f32 %v1315_v49, %v1315_v49 }
 0x1de   : > { %v1677_v42 = vadd.f32 %v1676_v40, %v1675_v33  ;;  %1535 = vst.msk [vmem:[%s2590_s8 + $0x3c] sm:$0xf] %vm1519_vm12, %v1926_v48  ;;  %v1578_v43 = vadd.f32 %v1577_v14, %v1576_v38  ;;  %v1680_v51 = vsel %vm909_vm3, %v1635_v41, 0.0  ;;  %v1682_v53 = vsel %vm909_vm3, %v1636_v46, 0.0 }
 0x1df   : > { %1533 = vst.msk [vmem:[%s2590_s8 + $0x34] sm:$0xf] %vm1519_vm12, %v1924_v27  ;;  %v1678_v50 = vsel %vm909_vm3, %v1634_v44, 0.0 }
 0x1e0   : > { %v1580_v47 = vadd.f32 %v1579_v45, %v1578_v43  ;;  %v1679_v60 = vadd.f32 %v1678_v50, %v1677_v42 }
 0x1e2   : > { %v1582_v23 = vadd.f32 %v1581_v30, %v1580_v47  ;;  %v1681_v52 = vadd.f32 %v1680_v51, %v1679_v60 }
 0x1e4   : > { %v1683_v54 = vadd.f32 %v1682_v53, %v1681_v52 }
 0x1f9   : > { %v1986_v55 = vpop.f32.mrb[0].mxu1 }
 0x1fa   : > { %v1929_v56 = vpack.c.bf16 %v1986_v55, %v1986_v55  ;;  %v1328_v57 = vpop.f32.mrb[1].mxu1  ;;  %v1639_v5 = vmul.f32 %v1986_v55, %v1986_v55  ;;  %v1587_v8 = vsel %vm909_vm3, %v1986_v55, 0.0 }
 0x1fb   : > { %v1927_v11 = vpack.c.bf16 %v1328_v57, %v1328_v57  ;;  %v1583_v58 = vsel %vm909_vm3, %v1328_v57, 0.0  ;;  %v1637_v59 = vmul.f32 %v1328_v57, %v1328_v57  ;;  %v1987_v29 = vpop.f32.mrb[2].mxu1 }
 0x1fc   : > { %1538 = vst.msk [vmem:[%s2590_s8 + $0x48] sm:$0xf] %vm1519_vm12, %v1929_v56  ;;  %v1584_v61 = vadd.f32 %v1583_v58, %v1582_v23  ;;  %v1930_v62 = vpack.c.bf16 %v1987_v29, %v1987_v29  ;;  %v1331_v9 = vpop.f32.mrb[3].mxu1  ;;  %v1640_v13 = vmul.f32 %v1987_v29, %v1987_v29  ;;  %v1589_v16 = vsel %vm909_vm3, %v1987_v29, 0.0 }
 0x1fd   : > { %1536 = vst.msk [vmem:[%s2590_s8 + $0x40] sm:$0xf] %vm1519_vm12, %v1927_v11  ;;  %v1684_v63 = vsel %vm909_vm3, %v1637_v59, 0.0  ;;  %v1928_v2 = vpack.c.bf16 %v1331_v9, %v1331_v9  ;;  %v1585_v4 = vsel %vm909_vm3, %v1331_v9, 0.0  ;;  %v1638_v7 = vmul.f32 %v1331_v9, %v1331_v9 }
 0x1fe   : > { %v1685_v6 = vadd.f32 %v1684_v63, %v1683_v54  ;;  %1539 = vst.msk [vmem:[%s2590_s8 + $0x4c] sm:$0xf] %vm1519_vm12, %v1930_v62  ;;  %v1586_v28 = vadd.f32 %v1585_v4, %v1584_v61  ;;  %v1688_v18 = vsel %vm909_vm3, %v1639_v5, 0.0  ;;  %v1690_v21 = vsel %vm909_vm3, %v1640_v13, 0.0 }
 0x1ff   : > { %1537 = vst.msk [vmem:[%s2590_s8 + $0x44] sm:$0xf] %vm1519_vm12, %v1928_v2  ;;  %v1686_v12 = vsel %vm909_vm3, %v1638_v7, 0.0 }
 0x200   : > { %v1588_v15 = vadd.f32 %v1587_v8, %v1586_v28  ;;  %v1687_v17 = vadd.f32 %v1686_v12, %v1685_v6 }
 0x202   : > { %v1590_v19 = vadd.f32 %v1589_v16, %v1588_v15  ;;  %v1689_v20 = vadd.f32 %v1688_v18, %v1687_v17 }
 0x204   : > { %v1691_v22 = vadd.f32 %v1690_v21, %v1689_v20 }
 0x219   : > { %v1990_v24 = vpop.f32.mrb[4].mxu1 }
 0x21a   : > { %v1933_v25 = vpack.c.bf16 %v1990_v24, %v1990_v24  ;;  %v1344_v26 = vpop.f32.mrb[5].mxu1  ;;  %v1643_v10 = vmul.f32 %v1990_v24, %v1990_v24  ;;  %v1595_v49 = vsel %vm909_vm3, %v1990_v24, 0.0 }
 0x21b   : > { %v1931_v3 = vpack.c.bf16 %v1344_v26, %v1344_v26  ;;  %v1591_v31 = vsel %vm909_vm3, %v1344_v26, 0.0  ;;  %v1641_v32 = vmul.f32 %v1344_v26, %v1344_v26  ;;  %v1991_v1 = vpop.f32.mrb[6].mxu1 }
 0x21c   : > { %1542 = vst.msk [vmem:[%s2590_s8 + $0x58] sm:$0xf] %vm1519_vm12, %v1933_v25  ;;  %v1592_v33 = vadd.f32 %v1591_v31, %v1590_v19  ;;  %v1934_v34 = vpack.c.bf16 %v1991_v1, %v1991_v1  ;;  %v1347_v39 = vpop.f32.mrb[7].mxu1  ;;  %v1644_v40 = vmul.f32 %v1991_v1, %v1991_v1  ;;  %v1597_v41 = vsel %vm909_vm3, %v1991_v1, 0.0 }
 0x21d   : > { %1540 = vst.msk [vmem:[%s2590_s8 + $0x50] sm:$0xf] %vm1519_vm12, %v1931_v3  ;;  %v1692_v35 = vsel %vm909_vm3, %v1641_v32, 0.0  ;;  %v1932_v36 = vpack.c.bf16 %v1347_v39, %v1347_v39  ;;  %v1593_v37 = vsel %vm909_vm3, %v1347_v39, 0.0  ;;  %v1642_v48 = vmul.f32 %v1347_v39, %v1347_v39 }
 0x21e   : > { %v1693_v0 = vadd.f32 %v1692_v35, %v1691_v22  ;;  %1543 = vst.msk [vmem:[%s2590_s8 + $0x5c] sm:$0xf] %vm1519_vm12, %v1934_v34  ;;  %v1594_v38 = vadd.f32 %v1593_v37, %v1592_v33  ;;  %v1696_v43 = vsel %vm909_vm3, %v1643_v10, 0.0  ;;  %v1698_v46 = vsel %vm909_vm3, %v1644_v40, 0.0 }
 0x21f   : > { %1541 = vst.msk [vmem:[%s2590_s8 + $0x54] sm:$0xf] %vm1519_vm12, %v1932_v36  ;;  %v1694_v14 = vsel %vm909_vm3, %v1642_v48, 0.0 }
 0x220   : > { %v1596_v27 = vadd.f32 %v1595_v49, %v1594_v38  ;;  %v1695_v42 = vadd.f32 %v1694_v14, %v1693_v0 }
 0x222   : > { %v1598_v44 = vadd.f32 %v1597_v41, %v1596_v27  ;;  %v1697_v45 = vadd.f32 %v1696_v43, %v1695_v42 }
 0x224   : > { %v1699_v47 = vadd.f32 %v1698_v46, %v1697_v45 }
 0x239   : > { %v1994_v50 = vpop.f32.mrb[8].mxu1 }
 0x23a   : > { %v1937_v30 = vpack.c.bf16 %v1994_v50, %v1994_v50  ;;  %v1360_v60 = vpop.f32.mrb[9].mxu1  ;;  %v1647_v59 = vmul.f32 %v1994_v50, %v1994_v50  ;;  %v1603_v9 = vsel %vm909_vm3, %v1994_v50, 0.0 }
 0x23b   : > { %v1935_v51 = vpack.c.bf16 %v1360_v60, %v1360_v60  ;;  %v1599_v23 = vsel %vm909_vm3, %v1360_v60, 0.0  ;;  %v1645_v52 = vmul.f32 %v1360_v60, %v1360_v60  ;;  %v1995_v53 = vpop.f32.mrb[10].mxu1 }
 0x23c   : > { %1546 = vst.msk [vmem:[%s2590_s8 + $0x68] sm:$0xf] %vm1519_vm12, %v1937_v30  ;;  %v1600_v54 = vadd.f32 %v1599_v23, %v1598_v44  ;;  %v1938_v55 = vpack.c.bf16 %v1995_v53, %v1995_v53  ;;  %v1363_v56 = vpop.f32.mrb[11].mxu1  ;;  %v1648_v63 = vmul.f32 %v1995_v53, %v1995_v53  ;;  %v1605_v5 = vsel %vm909_vm3, %v1995_v53, 0.0 }
 0x23d   : > { %1544 = vst.msk [vmem:[%s2590_s8 + $0x60] sm:$0xf] %vm1519_vm12, %v1935_v51  ;;  %v1700_v57 = vsel %vm909_vm3, %v1645_v52, 0.0  ;;  %v1936_v11 = vpack.c.bf16 %v1363_v56, %v1363_v56  ;;  %v1601_v58 = vsel %vm909_vm3, %v1363_v56, 0.0  ;;  %v1646_v62 = vmul.f32 %v1363_v56, %v1363_v56 }
 0x23e   : > { %v1701_v29 = vadd.f32 %v1700_v57, %v1699_v47  ;;  %1547 = vst.msk [vmem:[%s2590_s8 + $0x6c] sm:$0xf] %vm1519_vm12, %v1938_v55  ;;  %v1602_v61 = vadd.f32 %v1601_v58, %v1600_v54  ;;  %v1704_v28 = vsel %vm909_vm3, %v1647_v59, 0.0  ;;  %v1706_v13 = vsel %vm909_vm3, %v1648_v63, 0.0 }
 0x23f   : > { %1545 = vst.msk [vmem:[%s2590_s8 + $0x64] sm:$0xf] %vm1519_vm12, %v1936_v11  ;;  %v1702_v4 = vsel %vm909_vm3, %v1646_v62, 0.0 }
 0x240   : > { %v1604_v2 = vadd.f32 %v1603_v9, %v1602_v61  ;;  %v1703_v6 = vadd.f32 %v1702_v4, %v1701_v29 }
 0x242   : > { %v1606_v7 = vadd.f32 %v1605_v5, %v1604_v2  ;;  %v1705_v8 = vadd.f32 %v1704_v28, %v1703_v6 }
 0x244   : > { %v1707_v15 = vadd.f32 %v1706_v13, %v1705_v8 }
 0x256   : > { %v1998_v12 = vpop.f32.mrb[12].mxu1 }
 0x257   : > { %v1941_v16 = vpack.c.bf16 %v1998_v12, %v1998_v12  ;;  %v1376_v17 = vpop.f32.mrb[13].mxu1  ;;  %v1651_v32 = vmul.f32 %v1998_v12, %v1998_v12  ;;  %v1611_v39 = vsel %vm909_vm3, %v1998_v12, 0.0 }
 0x258   : > { %v1939_v18 = vpack.c.bf16 %v1376_v17, %v1376_v17  ;;  %v1607_v19 = vsel %vm909_vm3, %v1376_v17, 0.0  ;;  %v1649_v20 = vmul.f32 %v1376_v17, %v1376_v17  ;;  %v1999_v21 = vpop.f32.mrb[14].mxu1 }
 0x259   : > { %1550 = vst.msk [vmem:[%s2590_s8 + $0x78] sm:$0xf] %vm1519_vm12, %v1941_v16  ;;  %v1608_v22 = vadd.f32 %v1607_v19, %v1606_v7  ;;  %v1942_v24 = vpack.c.bf16 %v1999_v21, %v1999_v21  ;;  %v1379_v25 = vpop.f32.mrb[15].mxu1  ;;  %v1652_v35 = vmul.f32 %v1999_v21, %v1999_v21  ;;  %v1613_v10 = vsel %vm909_vm3, %v1999_v21, 0.0 }
 0x25a   : > { %1548 = vst.msk [vmem:[%s2590_s8 + $0x70] sm:$0xf] %vm1519_vm12, %v1939_v18  ;;  %v1708_v26 = vsel %vm909_vm3, %v1649_v20, 0.0  ;;  %v1940_v3 = vpack.c.bf16 %v1379_v25, %v1379_v25  ;;  %v1609_v31 = vsel %vm909_vm3, %v1379_v25, 0.0  ;;  %v1650_v34 = vmul.f32 %v1379_v25, %v1379_v25 }
 0x25b   : > { %v1709_v1 = vadd.f32 %v1708_v26, %v1707_v15  ;;  %1551 = vst.msk [vmem:[%s2590_s8 + $0x7c] sm:$0xf] %vm1519_vm12, %v1942_v24  ;;  %v1610_v33 = vadd.f32 %v1609_v31, %v1608_v22  ;;  %v1712_v38 = vsel %vm909_vm3, %v1651_v32, 0.0  ;;  %v1714_v40 = vsel %vm909_vm3, %v1652_v35, 0.0 }
 0x25c   : > { %1549 = vst.msk [vmem:[%s2590_s8 + $0x74] sm:$0xf] %vm1519_vm12, %v1940_v3  ;;  %v1710_v37 = vsel %vm909_vm3, %v1650_v34, 0.0 }
 0x25d   : > { %v1612_v36 = vadd.f32 %v1611_v39, %v1610_v33  ;;  %v1711_v0 = vadd.f32 %v1710_v37, %v1709_v1 }
 0x25f   : > { %v1614_v48 = vadd.f32 %v1613_v10, %v1612_v36  ;;  %v1713_v49 = vadd.f32 %v1712_v38, %v1711_v0 }
 0x261   : > { %v1615_v27 = vrot.slane %v1614_v48, 4  ;;  %v1715_v14 = vadd.f32 %v1714_v40, %v1713_v49 }
 0x263   : > { %v1616_v41 = vadd.f32 %v1615_v27, %v1614_v48  ;;  %v1716_v42 = vrot.slane %v1715_v14, 4 }
 0x265   : > { %v1617_v43 = vrot.slane %v1616_v41, 2  ;;  %v1717_v44 = vadd.f32 %v1716_v42, %v1715_v14 }
 0x267   : > { %v1618_v45 = vadd.f32 %v1617_v43, %v1616_v41  ;;  %v1718_v46 = vrot.slane %v1717_v44, 2 }
 0x269   : > { %v1619_v47 = vrot.slane %v1618_v45, 1  ;;  %v1719_v50 = vadd.f32 %v1718_v46, %v1717_v44 }
 0x26b   : > { %v1720_v30 = vrot.slane %v1719_v50, 1  ;;  %v1620_v60 = vadd.f32 %v1619_v47, %v1618_v45 }
 0x26d   : > { %v1721_v51 = vadd.f32 %v1720_v30, %v1719_v50 }
 0x26f   : > { %v1723_v23 = vsel %vm1722_vm13, %v1620_v60, %v1721_v51 }
 0x270   : > { %1725 = vst.msk [vmem:[%s181_s14] sm:$0x3] %vm1724_vm14, %v1723_v23 }
 0x271 PF: > { %s14_s12 = sadd.s32 1, %s2070_s12  }
 0x272   : > { %p11_p4 = scmp.ge.s32.totalorder %s14_s12, 4  }
 0x274   :  { %13 = sbr.rel (!%p11_p4) target bundleno = 1 (0x1), region = 70 }

</bundles_post_ra>
